<compile_context>
chip_gen: v7x
topology: tpu7x:2x2x1
jax: 0.10.0
libtpu: 0.0.40
codegen_flags: <defaults>
</compile_context>

<pallas_src>
import functools
import numpy as np
import jax
import jax.numpy as jnp
from jax.experimental import pallas as pl
from jax.experimental.pallas import tpu as pltpu


# ----------------------------------------------------------------------------
# Host-side parameter preparation
# ----------------------------------------------------------------------------
def _fold_bn_conv3x3(w_oihw, gamma, beta, mean, var, eps=1e-5):
    """Fold eval-mode BatchNorm into a bias-free 3x3 conv and fold the kw tap
    into the contraction dim.

    Returns:
      wf: (3, 3*Cin, Cout) bf16 weights, row index = kw * Cin + cin (per kh).
      bf: (1, Cout) f32 bias.
    """
    scale = gamma / jnp.sqrt(var + eps)                       # (Cout,)
    wt = jnp.transpose(w_oihw, (2, 3, 1, 0)) * scale          # (kh, kw, Cin, Cout)
    cin, cout = wt.shape[2], wt.shape[3]
    wf = wt.reshape(3, 3 * cin, cout).astype(jnp.bfloat16)
    bf = (beta - mean * scale).reshape(1, cout).astype(jnp.float32)
    return wf, bf


def _ceil_to(x, m):
    return -(-x // m) * m


def _buf_bytes(shape, dtype):
    """Approx. VMEM bytes of one buffer (last two dims tiled to (sublane, 128))."""
    item = jnp.dtype(dtype).itemsize
    sub = 8 * (4 // item)                       # f32 -> 8 sublanes/tile, bf16 -> 16
    lead = int(np.prod(shape[:-2], dtype=np.int64)) if len(shape) > 2 else 1
    return lead * _ceil_to(shape[-2], sub) * _ceil_to(shape[-1], 128) * item


def _vmem_estimate(TH, W, Cin, Cmid, Cout, out_dtype):
    """Conservative per-core VMEM estimate for one pipelined grid step."""
    b = 2 * _buf_bytes((TH, W + 2, Cin), jnp.float32)         # main input block (x2)
    b += 2 * _buf_bytes((4, W + 2, Cin), jnp.float32)         # 4-row halo block (x2)
    b += 2 * _buf_bytes((TH, W, Cout), out_dtype)             # output block (x2)
    b += _buf_bytes((TH + 2, W + 2, Cmid), jnp.float32)       # im scratch
    # compiler-managed value temporaries (window, concat slabs, accumulators)
    b += _buf_bytes((TH + 4, W + 2, Cin), jnp.float32)        # xwin
    b += _buf_bytes((TH + 4, W, 3 * Cin), jnp.float32)        # xcat (f32)
    b += _buf_bytes((TH + 4, W, 3 * Cin), jnp.bfloat16)       # xcat (bf16 copy)
    b += _buf_bytes((TH + 2, W, 3 * Cmid), jnp.float32)       # r1cat (f32)
    b += _buf_bytes((TH + 2, W, 3 * Cmid), jnp.bfloat16)      # r1cat (bf16 copy)
    b += _buf_bytes(((TH + 2) * W, Cmid), jnp.float32)        # acc1
    b += _buf_bytes((TH * W, Cout), jnp.float32)              # acc2
    return b


def _pick_row_tile(H, W, Cin, Cmid, Cout, out_dtype, budget_bytes):
    for th in (64, 32, 16, 8):
        if H % th == 0 and _vmem_estimate(th, W, Cin, Cmid, Cout,
                                          out_dtype) <= budget_bytes:
            return th
    raise ValueError("no valid row_tile: H must be a multiple of 8 and the "
                     "smallest tile must fit the VMEM budget")


# ----------------------------------------------------------------------------
# Kernel
# ----------------------------------------------------------------------------
def _basic_block_kernel(xm_ref, xh_ref, w1_ref, b1_ref, w2_ref, b2_ref,
                        o_ref, im_ref, *, no_relu):
    # xm_ref: (TH,   W+2, Cin)  padded-input rows [h*TH, h*TH + TH)          f32
    # xh_ref: (4,    W+2, Cin)  padded-input rows [h*TH + TH, h*TH + TH + 4) f32
    # w1_ref: (3, 3*Cin,  Cmid) conv1 weights, BN1 folded, K = (kw, cin)     bf16
    # b1_ref: (1, Cmid)         conv1+BN1 bias                               f32
    # w2_ref: (3, 3*Cmid, Cout) conv2 weights, BN2 folded                    bf16
    # b2_ref: (1, Cout)         conv2+BN2 bias                               f32
    # o_ref : (TH, W, Cout)     output row tile
    # im_ref: (TH+2, W+2, Cmid) scratch: relu(BN1(conv1(x))) + 1 halo row    f32
    TH, Wp, Cin = xm_ref.shape
    W = Wp - 2
    Cmid = w1_ref.shape[2]
    Cout = w2_ref.shape[2]
    h = pl.program_id(1)

    # (TH+4)-row halo window; residual slice below keeps the input precision.
    xwin = jnp.concatenate([xm_ref[...], xh_ref[...]], axis=0)  # (TH+4, W+2, Cin)

    # ---- conv1 + BN1 + ReLU on TH+2 rows (one halo row above/below the tile) ---
    # Width shifts folded into the contraction dim: features [x[w-1], x[w], x[w+1]].
    xcat = jnp.concatenate(
        [xwin[:, 0:W, :], xwin[:, 1:W + 1, :], xwin[:, 2:W + 2, :]],
        axis=-1).astype(jnp.bfloat16)                           # (TH+4, W, 3*Cin)
    acc1 = None
    for kh in range(3):
        a = xcat[kh:kh + TH + 2].reshape((TH + 2) * W, 3 * Cin)
        d = jnp.dot(a, w1_ref[kh], preferred_element_type=jnp.float32)
        acc1 = d if acc1 is None else acc1 + d
    r1 = jnp.maximum(acc1 + b1_ref[...], 0.0)                   # ((TH+2)*W, Cmid)

    # Stash into the width-padded scratch; only the two pad columns are zeroed.
    im_ref[:, 1:W + 1, :] = r1.reshape(TH + 2, W, Cmid)
    im_ref[:, 0:1, :] = jnp.zeros((TH + 2, 1, Cmid), jnp.float32)
    im_ref[:, W + 1:W + 2, :] = jnp.zeros((TH + 2, 1, Cmid), jnp.float32)

    # conv2 must see zeros (not conv1-of-padding) outside the image: fix the
    # single out-of-image halo row on the two edge tiles only.
    @pl.when(h == 0)
    def _():
        im_ref[0:1, :, :] = jnp.zeros((1, W + 2, Cmid), jnp.float32)

    @pl.when(h == pl.num_programs(1) - 1)
    def _():
        im_ref[TH + 1:TH + 2, :, :] = jnp.zeros((1, W + 2, Cmid), jnp.float32)

    # ---- conv2 + BN2 ------------------------------------------------------------
    r1cat = jnp.concatenate(
        [im_ref[:, 0:W, :], im_ref[:, 1:W + 1, :], im_ref[:, 2:W + 2, :]],
        axis=-1).astype(jnp.bfloat16)                           # (TH+2, W, 3*Cmid)
    acc2 = None
    for kh in range(3):
        a = r1cat[kh:kh + TH].reshape(TH * W, 3 * Cmid)
        d = jnp.dot(a, w2_ref[kh], preferred_element_type=jnp.float32)
        acc2 = d if acc2 is None else acc2 + d

    # ---- identity residual (stride=1, downsample=None) + final ReLU -------------
    resid = xwin[2:TH + 2, 1:W + 1, :].reshape(TH * W, Cin).astype(jnp.float32)
    out = acc2 + b2_ref[...] + resid
    if not no_relu:
        out = jnp.maximum(out, 0.0)
    o_ref[...] = out.reshape(TH, W, Cout).astype(o_ref.dtype)


# ----------------------------------------------------------------------------
# Wrappers
# ----------------------------------------------------------------------------
def basic_block_forward_nhwc(x_nhwc, w1_oihw, bn1, w2_oihw, bn2, *, eps=1e-5,
                             no_relu=False, row_tile=None, out_dtype=None,
                             vmem_budget_bytes=24 * 1024 * 1024):
    """Fused BasicBlock forward on NHWC activations (channels-last pipeline)."""
    # TODO(synk): stride>1 / downsample residual branch of BasicBlock is not
    # implemented (module defaults stride=1, downsample=None -> identity residual).
    N, H, W, Cin = x_nhwc.shape
    w1f, b1f = _fold_bn_conv3x3(w1_oihw, *bn1, eps=eps)
    w2f, b2f = _fold_bn_conv3x3(w2_oihw, *bn2, eps=eps)
    Cmid, Cout = w1f.shape[2], w2f.shape[2]
    assert Cout == Cin, "identity residual requires inplanes == planes"
    out_dtype = jnp.dtype(out_dtype or x_nhwc.dtype)
    TH = row_tile if row_tile is not None else _pick_row_tile(
        H, W, Cin, Cmid, Cout, out_dtype, vmem_budget_bytes)
    assert H % TH == 0 and TH % 4 == 0, "row_tile must divide H, multiple of 4"

    # Zero-pad 2 rows top/bottom (halo windows stay in-bounds) and 1 column each
    # side (conv width padding) in a single XLA op.
    # TODO(synk): in a full NHWC pipeline this pad would be fused into the layer
    # producing x instead of being a standalone copy.
    xp = jnp.pad(x_nhwc, ((0, 0), (2, 2), (1, 1), (0, 0)))

    flops = 2 * 9 * N * H * W * (Cin * Cmid + Cmid * Cout)
    bytes_accessed = int(xp.size * xp.dtype.itemsize
                         + N * H * W * Cout * out_dtype.itemsize
                         + 2 * (w1f.size + w2f.size) + 4 * (b1f.size + b2f.size))

    return pl.pallas_call(
        functools.partial(_basic_block_kernel, no_relu=no_relu),
        out_shape=jax.ShapeDtypeStruct((N, H, W, Cout), out_dtype),
        grid=(N, H // TH),
        in_specs=[
            # main window: padded rows [h*TH, h*TH + TH)
            pl.BlockSpec((pl.Squeezed(), TH, W + 2, Cin),
                         lambda n, h: (n, h, 0, 0)),
            # bottom halo: padded rows [h*TH + TH, h*TH + TH + 4)
            pl.BlockSpec((pl.Squeezed(), 4, W + 2, Cin),
                         lambda n, h: (n, (h + 1) * (TH // 4), 0, 0)),
            pl.BlockSpec((3, 3 * Cin, Cmid), lambda n, h: (0, 0, 0)),
            pl.BlockSpec((1, Cmid), lambda n, h: (0, 0)),
            pl.BlockSpec((3, 3 * Cmid, Cout), lambda n, h: (0, 0, 0)),
            pl.BlockSpec((1, Cout), lambda n, h: (0, 0)),
        ],
        out_specs=pl.BlockSpec((pl.Squeezed(), TH, W, Cout),
                               lambda n, h: (n, h, 0, 0)),
        scratch_shapes=[pltpu.VMEM((TH + 2, W + 2, Cmid), jnp.float32)],
        compiler_params=pltpu.CompilerParams(
            dimension_semantics=("parallel", "parallel"),
            vmem_limit_bytes=min(2 * vmem_budget_bytes, 100 * 1024 * 1024)),
        cost_estimate=pl.CostEstimate(flops=flops, transcendentals=0,
                                      bytes_accessed=bytes_accessed),
    )(xp, xp, w1f, b1f, w2f, b2f)


def basic_block_forward(x_nchw, w1_oihw, bn1, w2_oihw, bn2, **kwargs):
    """NCHW wrapper matching the PyTorch module interface (used by the demo)."""
    y = basic_block_forward_nhwc(jnp.transpose(x_nchw, (0, 2, 3, 1)),
                                 w1_oihw, bn1, w2_oihw, bn2, **kwargs)
    return jnp.transpose(y, (0, 3, 1, 2))


def basic_block_reference(x, w1_oihw, bn1, w2_oihw, bn2, *, eps=1e-5, no_relu=False):
    """Pure-JAX f32 reference with identical math (for validation)."""
    def conv_bn(inp, w, bn):
        g, b, m, v = bn
        y = jax.lax.conv_general_dilated(
            inp, w, window_strides=(1, 1), padding=((1, 1), (1, 1)),
            dimension_numbers=('NCHW', 'OIHW', 'NCHW'),
            precision=jax.lax.Precision.HIGHEST)
        s = g / jnp.sqrt(v + eps)
        return y * s[None, :, None, None] + (b - m * s)[None, :, None, None]

    out = jax.nn.relu(conv_bn(x, w1_oihw, bn1))
    out = conv_bn(out, w2_oihw, bn2)
    out = out + x
    return out if no_relu else jax.nn.relu(out)


if __name__ == "__main__":
    # Small deterministic config: BasicBlock(inplanes=32, planes=32), 16x16 input.
    N, C, H, W = 2, 32, 16, 16
    key = jax.random.PRNGKey(0)
    kx, k1, k2 = jax.random.split(key, 3)

    x = jax.random.normal(kx, (N, C, H, W), dtype=jnp.float32)
    w1 = 0.1 * jax.random.normal(k1, (C, C, 3, 3), dtype=jnp.float32)
    w2 = 0.1 * jax.random.normal(k2, (C, C, 3, 3), dtype=jnp.float32)

    # Deterministic synthetic eval-mode BatchNorm parameters / running stats.
    ar = jnp.arange(C, dtype=jnp.float32)
    bn1 = (1.0 + 0.05 * ar, 0.02 * ar, 0.01 * ar, 1.0 + 0.03 * ar)
    bn2 = (1.0 - 0.02 * ar, -0.01 * ar, 0.015 * ar, 1.0 + 0.04 * ar)

    ref = jax.block_until_ready(basic_block_reference(x, w1, bn1, w2, bn2))
    r = np.asarray(ref)

    # row_tile=8 exercises the multi-tile halo path; None auto-picks (=16 -> H==TH).
    for rt in (8, None):
        out = jax.block_until_ready(
            basic_block_forward(x, w1, bn1, w2, bn2, no_relu=False, row_tile=rt))
        assert out.shape == (N, C, H, W)
        o = np.asarray(out)
        rel_l2 = np.linalg.norm(o - r) / np.linalg.norm(r)
        assert rel_l2 < 2e-2, f"relative L2 error too large: {rel_l2}"
        # bf16 MXU operands vs. an f32/HIGHEST reference -> loose elementwise bound,
        # tight aggregate bound above.
        np.testing.assert_allclose(o, r, rtol=1e-1, atol=1e-1)

    print("KERNEL_OK")
</pallas_src>

<mosaic_0001>
module attributes {stable_mosaic.version = 11 : i64} {
  func.func @_basic_block_kernel(%arg0: i32, %arg1: i32, %arg2: memref<1x8x18x32xf32, #tpu.memory_space<vmem>>, %arg3: memref<1x4x18x32xf32, #tpu.memory_space<vmem>>, %arg4: memref<3x96x32xbf16, #tpu.memory_space<vmem>>, %arg5: memref<1x32xf32, #tpu.memory_space<vmem>>, %arg6: memref<3x96x32xbf16, #tpu.memory_space<vmem>>, %arg7: memref<1x32xf32, #tpu.memory_space<vmem>>, %arg8: memref<1x8x16x32xf32, #tpu.memory_space<vmem>>, %arg9: memref<10x18x32xf32, #tpu.memory_space<vmem>>) attributes {dimension_semantics = [#tpu.dimension_semantics<parallel>, #tpu.dimension_semantics<parallel>], iteration_bounds = array<i64: 2, 2>, scalar_prefetch = 0 : i64, scratch_operands = 1 : i64, tpu.core_type = #tpu.core_type<tc>, window_params = [{transform_indices = @transform_0, window_bounds = array<i64: 1, 8, 18, 32>}, {transform_indices = @transform_1, window_bounds = array<i64: 1, 4, 18, 32>}, {pipeline_mode = #tpu.pipeline_mode<synchronous>, transform_indices = @transform_2, window_bounds = array<i64: 3, 96, 32>}, {pipeline_mode = #tpu.pipeline_mode<synchronous>, transform_indices = @transform_3, window_bounds = array<i64: 1, 32>}, {pipeline_mode = #tpu.pipeline_mode<synchronous>, transform_indices = @transform_4, window_bounds = array<i64: 3, 96, 32>}, {pipeline_mode = #tpu.pipeline_mode<synchronous>, transform_indices = @transform_5, window_bounds = array<i64: 1, 32>}, {transform_indices = @transform_6, window_bounds = array<i64: 1, 8, 16, 32>}]} {
    %c0 = arith.constant 0 : index
    %c0_0 = arith.constant 0 : index
    %c0_1 = arith.constant 0 : index
    %c0_2 = arith.constant 0 : index
    %0 = vector.load %arg2[%c0, %c0_0, %c0_1, %c0_2] : memref<1x8x18x32xf32, #tpu.memory_space<vmem>>, vector<1x8x18x32xf32>
    %1 = vector.shape_cast %0 : vector<1x8x18x32xf32> to vector<8x18x32xf32>
    %c0_3 = arith.constant 0 : index
    %c0_4 = arith.constant 0 : index
    %c0_5 = arith.constant 0 : index
    %c0_6 = arith.constant 0 : index
    %2 = vector.load %arg3[%c0_3, %c0_4, %c0_5, %c0_6] : memref<1x4x18x32xf32, #tpu.memory_space<vmem>>, vector<1x4x18x32xf32>
    %3 = vector.shape_cast %2 : vector<1x4x18x32xf32> to vector<4x18x32xf32>
    %4 = tpu.concatenate %1, %3 in 0 : vector<8x18x32xf32>, vector<4x18x32xf32> -> vector<12x18x32xf32>
    %5 = vector.extract_strided_slice %4 {offsets = [0, 0, 0], sizes = [12, 16, 32], strides = [1, 1, 1]} : vector<12x18x32xf32> to vector<12x16x32xf32>
    %6 = vector.extract_strided_slice %4 {offsets = [0, 1, 0], sizes = [12, 16, 32], strides = [1, 1, 1]} : vector<12x18x32xf32> to vector<12x16x32xf32>
    %7 = vector.extract_strided_slice %4 {offsets = [0, 2, 0], sizes = [12, 16, 32], strides = [1, 1, 1]} : vector<12x18x32xf32> to vector<12x16x32xf32>
    %8 = tpu.concatenate %5, %6, %7 in 2 : vector<12x16x32xf32>, vector<12x16x32xf32>, vector<12x16x32xf32> -> vector<12x16x96xf32>
    %9 = arith.truncf %8 : vector<12x16x96xf32> to vector<12x16x96xbf16>
    %10 = vector.extract_strided_slice %9 {offsets = [0, 0, 0], sizes = [10, 16, 96], strides = [1, 1, 1]} : vector<12x16x96xbf16> to vector<10x16x96xbf16>
    %11 = vector.shape_cast %10 : vector<10x16x96xbf16> to vector<160x96xbf16>
    %c0_7 = arith.constant 0 : index
    %c0_8 = arith.constant 0 : index
    %c0_9 = arith.constant 0 : index
    %12 = vector.load %arg4[%c0_7, %c0_8, %c0_9] : memref<3x96x32xbf16, #tpu.memory_space<vmem>>, vector<1x96x32xbf16>
    %13 = vector.shape_cast %12 : vector<1x96x32xbf16> to vector<96x32xbf16>
    %cst = arith.constant dense<0.000000e+00> : vector<160x32xf32>
    %14 = tpu.matmul %11, %13, %cst {dimension_numbers = #tpu.dot_dimension_numbers<[1], [0], [0], [1], [0, 0, 1, 1], [], []>} : vector<160x96xbf16>, vector<96x32xbf16>, vector<160x32xf32> -> vector<160x32xf32>
    %15 = vector.extract_strided_slice %9 {offsets = [1, 0, 0], sizes = [10, 16, 96], strides = [1, 1, 1]} : vector<12x16x96xbf16> to vector<10x16x96xbf16>
    %16 = vector.shape_cast %15 : vector<10x16x96xbf16> to vector<160x96xbf16>
    %c1 = arith.constant 1 : index
    %c0_10 = arith.constant 0 : index
    %c0_11 = arith.constant 0 : index
    %17 = vector.load %arg4[%c1, %c0_10, %c0_11] : memref<3x96x32xbf16, #tpu.memory_space<vmem>>, vector<1x96x32xbf16>
    %18 = vector.shape_cast %17 : vector<1x96x32xbf16> to vector<96x32xbf16>
    %cst_12 = arith.constant dense<0.000000e+00> : vector<160x32xf32>
    %19 = tpu.matmul %16, %18, %cst_12 {dimension_numbers = #tpu.dot_dimension_numbers<[1], [0], [0], [1], [0, 0, 1, 1], [], []>} : vector<160x96xbf16>, vector<96x32xbf16>, vector<160x32xf32> -> vector<160x32xf32>
    %20 = arith.addf %14, %19 : vector<160x32xf32>
    %21 = vector.extract_strided_slice %9 {offsets = [2, 0, 0], sizes = [10, 16, 96], strides = [1, 1, 1]} : vector<12x16x96xbf16> to vector<10x16x96xbf16>
    %22 = vector.shape_cast %21 : vector<10x16x96xbf16> to vector<160x96xbf16>
    %c2 = arith.constant 2 : index
    %c0_13 = arith.constant 0 : index
    %c0_14 = arith.constant 0 : index
    %23 = vector.load %arg4[%c2, %c0_13, %c0_14] : memref<3x96x32xbf16, #tpu.memory_space<vmem>>, vector<1x96x32xbf16>
    %24 = vector.shape_cast %23 : vector<1x96x32xbf16> to vector<96x32xbf16>
    %cst_15 = arith.constant dense<0.000000e+00> : vector<160x32xf32>
    %25 = tpu.matmul %22, %24, %cst_15 {dimension_numbers = #tpu.dot_dimension_numbers<[1], [0], [0], [1], [0, 0, 1, 1], [], []>} : vector<160x96xbf16>, vector<96x32xbf16>, vector<160x32xf32> -> vector<160x32xf32>
    %26 = arith.addf %20, %25 : vector<160x32xf32>
    %c0_16 = arith.constant 0 : index
    %c0_17 = arith.constant 0 : index
    %27 = vector.load %arg5[%c0_16, %c0_17] : memref<1x32xf32, #tpu.memory_space<vmem>>, vector<1x32xf32>
    %28 = vector.broadcast %27 : vector<1x32xf32> to vector<160x32xf32>
    %29 = arith.addf %26, %28 : vector<160x32xf32>
    %cst_18 = arith.constant 0.000000e+00 : f32
    %30 = vector.broadcast %cst_18 : f32 to vector<160x32xf32>
    %31 = arith.maximumf %29, %30 : vector<160x32xf32>
    %32 = vector.shape_cast %31 : vector<160x32xf32> to vector<10x16x32xf32>
    %c0_19 = arith.constant 0 : index
    %c1_20 = arith.constant 1 : index
    %c0_21 = arith.constant 0 : index
    %33 = vector.load %arg9[%c0_19, %c1_20, %c0_21] : memref<10x18x32xf32, #tpu.memory_space<vmem>>, vector<10x16x32xf32>
    tpu.vector_store %arg9[%c0_19, %c1_20, %c0_21], %32 {strides = array<i32>} : memref<10x18x32xf32, #tpu.memory_space<vmem>>, vector<10x16x32xf32>,
    %cst_22 = arith.constant 0.000000e+00 : f32
    %34 = vector.broadcast %cst_22 : f32 to vector<10x1x32xf32>
    %c0_23 = arith.constant 0 : index
    %c0_24 = arith.constant 0 : index
    %c0_25 = arith.constant 0 : index
    %35 = vector.load %arg9[%c0_23, %c0_24, %c0_25] : memref<10x18x32xf32, #tpu.memory_space<vmem>>, vector<10x1x32xf32>
    tpu.vector_store %arg9[%c0_23, %c0_24, %c0_25], %34 {strides = array<i32>} : memref<10x18x32xf32, #tpu.memory_space<vmem>>, vector<10x1x32xf32>,
    %cst_26 = arith.constant 0.000000e+00 : f32
    %36 = vector.broadcast %cst_26 : f32 to vector<10x1x32xf32>
    %c0_27 = arith.constant 0 : index
    %c17 = arith.constant 17 : index
    %c0_28 = arith.constant 0 : index
    %37 = vector.load %arg9[%c0_27, %c17, %c0_28] : memref<10x18x32xf32, #tpu.memory_space<vmem>>, vector<10x1x32xf32>
    tpu.vector_store %arg9[%c0_27, %c17, %c0_28], %36 {strides = array<i32>} : memref<10x18x32xf32, #tpu.memory_space<vmem>>, vector<10x1x32xf32>,
    %c0_i32 = arith.constant 0 : i32
    %38 = arith.cmpi eq, %arg1, %c0_i32 : i32
    %39 = arith.extui %38 : i1 to i32
    %c0_i32_29 = arith.constant 0 : i32
    %40 = arith.cmpi ne, %39, %c0_i32_29 : i32
    scf.if %40 {
      %cst_59 = arith.constant 0.000000e+00 : f32
      %78 = vector.broadcast %cst_59 : f32 to vector<1x18x32xf32>
      %c0_60 = arith.constant 0 : index
      %c0_61 = arith.constant 0 : index
      %c0_62 = arith.constant 0 : index
      %79 = vector.load %arg9[%c0_60, %c0_61, %c0_62] : memref<10x18x32xf32, #tpu.memory_space<vmem>>, vector<1x18x32xf32>
      tpu.vector_store %arg9[%c0_60, %c0_61, %c0_62], %78 {strides = array<i32>} : memref<10x18x32xf32, #tpu.memory_space<vmem>>, vector<1x18x32xf32>,
    } else {
    }
    %c1_i32 = arith.constant 1 : i32
    %41 = arith.cmpi eq, %arg1, %c1_i32 : i32
    %42 = arith.extui %41 : i1 to i32
    %c0_i32_30 = arith.constant 0 : i32
    %43 = arith.cmpi ne, %42, %c0_i32_30 : i32
    scf.if %43 {
      %cst_59 = arith.constant 0.000000e+00 : f32
      %78 = vector.broadcast %cst_59 : f32 to vector<1x18x32xf32>
      %c9 = arith.constant 9 : index
      %c0_60 = arith.constant 0 : index
      %c0_61 = arith.constant 0 : index
      %79 = vector.load %arg9[%c9, %c0_60, %c0_61] : memref<10x18x32xf32, #tpu.memory_space<vmem>>, vector<1x18x32xf32>
      tpu.vector_store %arg9[%c9, %c0_60, %c0_61], %78 {strides = array<i32>} : memref<10x18x32xf32, #tpu.memory_space<vmem>>, vector<1x18x32xf32>,
    } else {
    }
    %c0_31 = arith.constant 0 : index
    %c0_32 = arith.constant 0 : index
    %c0_33 = arith.constant 0 : index
    %44 = vector.load %arg9[%c0_31, %c0_32, %c0_33] : memref<10x18x32xf32, #tpu.memory_space<vmem>>, vector<10x16x32xf32>
    %c0_34 = arith.constant 0 : index
    %c1_35 = arith.constant 1 : index
    %c0_36 = arith.constant 0 : index
    %45 = vector.load %arg9[%c0_34, %c1_35, %c0_36] : memref<10x18x32xf32, #tpu.memory_space<vmem>>, vector<10x16x32xf32>
    %c0_37 = arith.constant 0 : index
    %c2_38 = arith.constant 2 : index
    %c0_39 = arith.constant 0 : index
    %46 = vector.load %arg9[%c0_37, %c2_38, %c0_39] : memref<10x18x32xf32, #tpu.memory_space<vmem>>, vector<10x16x32xf32>
    %47 = tpu.concatenate %44, %45, %46 in 2 : vector<10x16x32xf32>, vector<10x16x32xf32>, vector<10x16x32xf32> -> vector<10x16x96xf32>
    %48 = arith.truncf %47 : vector<10x16x96xf32> to vector<10x16x96xbf16>
    %49 = vector.extract_strided_slice %48 {offsets = [0, 0, 0], sizes = [8, 16, 96], strides = [1, 1, 1]} : vector<10x16x96xbf16> to vector<8x16x96xbf16>
    %50 = vector.shape_cast %49 : vector<8x16x96xbf16> to vector<128x96xbf16>
    %c0_40 = arith.constant 0 : index
    %c0_41 = arith.constant 0 : index
    %c0_42 = arith.constant 0 : index
    %51 = vector.load %arg6[%c0_40, %c0_41, %c0_42] : memref<3x96x32xbf16, #tpu.memory_space<vmem>>, vector<1x96x32xbf16>
    %52 = vector.shape_cast %51 : vector<1x96x32xbf16> to vector<96x32xbf16>
    %cst_43 = arith.constant dense<0.000000e+00> : vector<128x32xf32>
    %53 = tpu.matmul %50, %52, %cst_43 {dimension_numbers = #tpu.dot_dimension_numbers<[1], [0], [0], [1], [0, 0, 1, 1], [], []>} : vector<128x96xbf16>, vector<96x32xbf16>, vector<128x32xf32> -> vector<128x32xf32>
    %54 = vector.extract_strided_slice %48 {offsets = [1, 0, 0], sizes = [8, 16, 96], strides = [1, 1, 1]} : vector<10x16x96xbf16> to vector<8x16x96xbf16>
    %55 = vector.shape_cast %54 : vector<8x16x96xbf16> to vector<128x96xbf16>
    %c1_44 = arith.constant 1 : index
    %c0_45 = arith.constant 0 : index
    %c0_46 = arith.constant 0 : index
    %56 = vector.load %arg6[%c1_44, %c0_45, %c0_46] : memref<3x96x32xbf16, #tpu.memory_space<vmem>>, vector<1x96x32xbf16>
    %57 = vector.shape_cast %56 : vector<1x96x32xbf16> to vector<96x32xbf16>
    %cst_47 = arith.constant dense<0.000000e+00> : vector<128x32xf32>
    %58 = tpu.matmul %55, %57, %cst_47 {dimension_numbers = #tpu.dot_dimension_numbers<[1], [0], [0], [1], [0, 0, 1, 1], [], []>} : vector<128x96xbf16>, vector<96x32xbf16>, vector<128x32xf32> -> vector<128x32xf32>
    %59 = arith.addf %53, %58 : vector<128x32xf32>
    %60 = vector.extract_strided_slice %48 {offsets = [2, 0, 0], sizes = [8, 16, 96], strides = [1, 1, 1]} : vector<10x16x96xbf16> to vector<8x16x96xbf16>
    %61 = vector.shape_cast %60 : vector<8x16x96xbf16> to vector<128x96xbf16>
    %c2_48 = arith.constant 2 : index
    %c0_49 = arith.constant 0 : index
    %c0_50 = arith.constant 0 : index
    %62 = vector.load %arg6[%c2_48, %c0_49, %c0_50] : memref<3x96x32xbf16, #tpu.memory_space<vmem>>, vector<1x96x32xbf16>
    %63 = vector.shape_cast %62 : vector<1x96x32xbf16> to vector<96x32xbf16>
    %cst_51 = arith.constant dense<0.000000e+00> : vector<128x32xf32>
    %64 = tpu.matmul %61, %63, %cst_51 {dimension_numbers = #tpu.dot_dimension_numbers<[1], [0], [0], [1], [0, 0, 1, 1], [], []>} : vector<128x96xbf16>, vector<96x32xbf16>, vector<128x32xf32> -> vector<128x32xf32>
    %65 = arith.addf %59, %64 : vector<128x32xf32>
    %66 = vector.extract_strided_slice %4 {offsets = [2, 1, 0], sizes = [8, 16, 32], strides = [1, 1, 1]} : vector<12x18x32xf32> to vector<8x16x32xf32>
    %67 = vector.shape_cast %66 : vector<8x16x32xf32> to vector<128x32xf32>
    %c0_52 = arith.constant 0 : index
    %c0_53 = arith.constant 0 : index
    %68 = vector.load %arg7[%c0_52, %c0_53] : memref<1x32xf32, #tpu.memory_space<vmem>>, vector<1x32xf32>
    %69 = vector.broadcast %68 : vector<1x32xf32> to vector<128x32xf32>
    %70 = arith.addf %65, %69 : vector<128x32xf32>
    %71 = arith.addf %70, %67 : vector<128x32xf32>
    %cst_54 = arith.constant 0.000000e+00 : f32
    %72 = vector.broadcast %cst_54 : f32 to vector<128x32xf32>
    %73 = arith.maximumf %71, %72 : vector<128x32xf32>
    %74 = vector.shape_cast %73 : vector<128x32xf32> to vector<8x16x32xf32>
    %c0_55 = arith.constant 0 : index
    %c0_56 = arith.constant 0 : index
    %c0_57 = arith.constant 0 : index
    %c0_58 = arith.constant 0 : index
    %75 = vector.load %arg8[%c0_55, %c0_56, %c0_57, %c0_58] : memref<1x8x16x32xf32, #tpu.memory_space<vmem>>, vector<1x8x16x32xf32>
    %76 = vector.shape_cast %75 : vector<1x8x16x32xf32> to vector<8x16x32xf32>
    %77 = vector.shape_cast %74 : vector<8x16x32xf32> to vector<1x8x16x32xf32>
    tpu.vector_store %arg8[%c0_55, %c0_56, %c0_57, %c0_58], %77 {strides = array<i32>} : memref<1x8x16x32xf32, #tpu.memory_space<vmem>>, vector<1x8x16x32xf32>,
    return
  }
  func.func @transform_0(%arg0: i32, %arg1: i32) -> (i32, i32, i32, i32) {
    %c0_i32 = arith.constant 0 : i32
    %c0_i32_0 = arith.constant 0 : i32
    %c0_i32_1 = arith.constant 0 : i32
    return %arg0, %arg1, %c0_i32, %c0_i32_0 : i32, i32, i32, i32
  }
  func.func @transform_1(%arg0: i32, %arg1: i32) -> (i32, i32, i32, i32) {
    %c1_i32 = arith.constant 1 : i32
    %0 = arith.addi %arg1, %c1_i32 : i32
    %c2_i32 = arith.constant 2 : i32
    %1 = arith.muli %0, %c2_i32 : i32
    %c0_i32 = arith.constant 0 : i32
    %c0_i32_0 = arith.constant 0 : i32
    %c0_i32_1 = arith.constant 0 : i32
    return %arg0, %1, %c0_i32, %c0_i32_0 : i32, i32, i32, i32
  }
  func.func @transform_2(%arg0: i32, %arg1: i32) -> (i32, i32, i32) {
    %c0_i32 = arith.constant 0 : i32
    %c0_i32_0 = arith.constant 0 : i32
    %c0_i32_1 = arith.constant 0 : i32
    %c0_i32_2 = arith.constant 0 : i32
    return %c0_i32, %c0_i32_0, %c0_i32_1 : i32, i32, i32
  }
  func.func @transform_3(%arg0: i32, %arg1: i32) -> (i32, i32) {
    %c0_i32 = arith.constant 0 : i32
    %c0_i32_0 = arith.constant 0 : i32
    %c0_i32_1 = arith.constant 0 : i32
    return %c0_i32, %c0_i32_0 : i32, i32
  }
  func.func @transform_4(%arg0: i32, %arg1: i32) -> (i32, i32, i32) {
    %c0_i32 = arith.constant 0 : i32
    %c0_i32_0 = arith.constant 0 : i32
    %c0_i32_1 = arith.constant 0 : i32
    %c0_i32_2 = arith.constant 0 : i32
    return %c0_i32, %c0_i32_0, %c0_i32_1 : i32, i32, i32
  }
  func.func @transform_5(%arg0: i32, %arg1: i32) -> (i32, i32) {
    %c0_i32 = arith.constant 0 : i32
    %c0_i32_0 = arith.constant 0 : i32
    %c0_i32_1 = arith.constant 0 : i32
    return %c0_i32, %c0_i32_0 : i32, i32
  }
  func.func @transform_6(%arg0: i32, %arg1: i32) -> (i32, i32, i32, i32) {
    %c0_i32 = arith.constant 0 : i32
    %c0_i32_0 = arith.constant 0 : i32
    %c0_i32_1 = arith.constant 0 : i32
    return %arg0, %arg1, %c0_i32, %c0_i32_0 : i32, i32, i32, i32
  }
}

</mosaic_0001>

<bundles_post_ra>
// kernel: tpu_custom_call.1
= control target key start
LH: loop header
LB: loop body
LE: loop exit
PB: predicated region body
PF: predicated region fallthrough
CT: control target
= control target key end

     0   :  { %11 = vsyncpa [#allocation4], 0  ;;  %s4296_s0 = inlined_call_operand.vmem [shape: f32[2,20,18,32], index: 0, kind: input, shape index: {}]   ;;  %s4297_s1 = inlined_call_operand.vmem [shape: f32[2,20,18,32], index: 1, kind: input, shape index: {}]   ;;  %s4298_s2 = inlined_call_operand.vmem [shape: bf16[3,96,32], index: 2, kind: input, shape index: {}]   ;;  %s4299_s3 = inlined_call_operand.vmem [shape: f32[1,32], index: 3, kind: input, shape index: {}]   ;;  %s4300_s4 = inlined_call_operand.vmem [shape: bf16[3,96,32], index: 4, kind: input, shape index: {}]   ;;  %s4301_s5 = inlined_call_operand.vmem [shape: f32[1,32], index: 5, kind: input, shape index: {}]   ;;  %s4302_s6 = inlined_call_operand.hbm [shape: f32[2,16,16,32], index: 6, kind: output, shape index: {}]  }
   0x1   :  { %13 = vsyncpa [#allocation4 + $0x1], 0  ;;  %s3363_s21 = smov 0   ;;  %s3365_s22 = smov 0  }
   0x2   :  { %s3367_s23 = smov 0   ;;  %s3369_s24 = smov 0  }
   0x3   :  { %s3371_s25 = smov 0   ;;  %s3373_s26 = smov 0  }
   0x4   :  { %s3375_s27 = smov 0   ;;  %s3377_s28 = smov 0  }
   0x5 LB: > { %4306 = sst [smem:[#allocation6_spill]] %s3314_s27  ;;  %s2373_s29 = sadd.s32 4294967295, %s3318_s28   ;;  %s3318_s28 = sphi %s3377_s28, %s19_s28   ;;  %s3314_s27 = sphi %s3375_s27, %s4314_s27   ;;  %s3310_s26 = sphi %s3373_s26, %s4319_s26   ;;  %s3306_s25 = sphi %s3371_s25, %s4312_s25   ;;  %s3302_s24 = sphi %s3369_s24, %s4318_s24   ;;  %s3298_s23 = sphi %s3367_s23, %s4317_s23   ;;  %s3294_s22 = sphi %s3365_s22, %s4316_s22   ;;  %s3290_s21 = sphi %s3363_s21, %s4315_s21  }
   0x6   : > { %s2374_s30 = sadd.s32 4294967294, %s3318_s28   ;;  %s28_s7 = sadd.s32 1, %s3310_s26 }
   0x7   : > { %p29_p0 = scmp.ge.s32.totalorder %s28_s7, 2  ;;  %s31_s8 = sadd.s32 1, %s3314_s27 }
   0x8   : > { %p194_p1 = scmp.ne.s32.totalorder %s3298_s23, %s3294_s22  ;;  %p195_p2 = scmp.eq.s32.totalorder %s2373_s29, 3 }
   0x9   : > { %s4321_s7 = smov (%p29_p0, %s28_s7), 0  ;;  %s4323_s8 = smov (!%p29_p0, %s31_s8), %s3314_s27 }
   0xa   : > { %4307 = sst [smem:[#allocation7_spill]] %s4321_s7  ;;  %s180_s9 = ssub.s32 %s3310_s26, %s4321_s7 }
   0xb   : > { %p3414_p3 = por %p195_p2, %p194_p1  ;;  %p33_p4 = scmp.ge.s32.totalorder %s4323_s8, 2 }
   0xc   : > { %p200_p5 = scmp.ne.s32.totalorder %s3294_s22, %s3290_s21  ;;  %p201_p6 = scmp.eq.s32.totalorder %s2374_s30, 3 }
   0xd   : > { %p2379_p7 = scmp.ge.s32.totalorder %s3318_s28, 1  ;;  %s4325_s8 = smov (%p33_p4, %s4323_s8), 0 }
   0xe   : > { %4309 = sst [smem:[#allocation8_spill]] %s4325_s8  ;;  %p3423_p8 = por %p201_p6, %p200_p5 }
   0xf   : > { %p273_p9 = scmp.lt.s32.totalorder %s3318_s28, 5  ;;  %s179_s12 = ssub.s32 %s3314_s27, %s4325_s8 }
  0x10   : > { %s184_s13 = sadd.s32 1, %s3298_s23  ;;  %s181_s14 = sor.u32 %s180_s9, %s179_s12 }
  0x11   : > { %p274_p10 = pnand %p2379_p7, %p273_p9  ;;  %p182_p11 = scmp.eq.s32.totalorder %s181_s14, 0 }
  0x12   : > { %s2381_s16 = sshll.u32 (!%p274_p10), %s3302_s24, 3  ;;  %p331_p12 = scmp.lt.s32.totalorder (!%p274_p10), %s3306_s25, 1  ;;  %v3088_v0 = vld [vmem:[%s4298_s2 + $0x30] sm:$0xff] (!%p274_p10)   ;;  %v3089_v1 = vld [vmem:[%s4298_s2 + $0x38] sm:$0xff] (!%p274_p10)   ;;  %v3090_v2 = vld [vmem:[%s4298_s2 + $0x40] sm:$0xff] (!%p274_p10)   ;;  %vm568_vm0 = vcmask (!%p274_p10), 1045504  }
  0x13   : > { %s3432_s15 = scalar_select %p182_p11, %s3298_s23, %s184_s13  }
  0x14   : > { %277 = sbr.rel (%p274_p10) target bundleno = 961 (0x3c1), region = 44  ;;  %p333_p13 = scmp.lt.s32.totalorder (!%p274_p10), %s2381_s16, 19  ;;  %2635 = vmatprep.subr.bf16.mxu0 (!%p274_p10), %v3088_v0  ;;  %v3091_v3 = vld [vmem:[%s4298_s2 + $0x48] sm:$0xff] (!%p274_p10)   ;;  %vm435_vm1 = vcmask (!%p274_p10), 1046528   ;;  %v3092_v13 = vld [vmem:[%s4298_s2 + $0x50] sm:$0xff] (!%p274_p10)   ;;  %v3093_v45 = vld [vmem:[%s4298_s2 + $0x58] sm:$0xff] (!%p274_p10)  }
  0x15   : > { %2636 = vmatpush3.bf16.msra.mxu0 (!%p274_p10), %v3088_v0  ;;  %s2544_s8 = sadd.s32 (!%p274_p10), 8, %s2381_s16  ;;  %s322_s18 = sand.u32 (!%p274_p10), 1, %s3294_s22   ;;  %vm701_vm2 = vcmask (!%p274_p10), 261120   ;;  %vm726_vm3 = vcmask (!%p274_p10), 523264   ;;  %vm824_vm4 = vcmask (!%p274_p10), 785408   ;;  %vm1372_vm5 = vcmask (!%p274_p10), 253952  }
  0x16   : > { %2637 = vmatprep.subr.bf16.mxu0 (!%p274_p10), %v3089_v1  ;;  %p3449_p0 = scmp.lt.s32.totalorder (!%p274_p10), %s2544_s8, 19  ;;  %s3458_s20 = sshll.u32 (!%p274_p10), %s322_s18, 7 }
  0x17   : > { %s3320_s17 = smov (!%p274_p10), 64   ;;  %s3988_s12 = scalar_lea.vmem (!%p274_p10), [#allocation3], %s3458_s20 }
  0x18   : > { %p2459_p1 = scmp.ne.s32.totalorder (!%p274_p10), %s3302_s24, 0 }
  0x19   : > { %2638 = vmatpush3.bf16.msra.mxu0 (!%p274_p10), %v3089_v1 }
  0x1a   : > { %2639 = vmatprep.subr.bf16.mxu0 (!%p274_p10), %v3090_v2 }
  0x1b   : > { %s3443_s29 = scalar_select %p331_p12, %s3306_s25, 1 }
  0x1c   : > { %s334_s30 = scalar_select %p333_p13, %s2381_s16, 19 }
  0x1d   : > { %s2888_s9 = smul.u32 60, %s3443_s29  ;;  %s4327_s8 = smov (!%p3449_p0, %s2544_s8), 19  ;;  %2640 = vmatpush3.bf16.msra.mxu0 %v3090_v2  ;;  %vm1399_vm6 = vcmask (!%p2459_p1), 254976  }
  0x1e   : > { %s2887_s14 = smul.u32 3, %s334_s30  ;;  %2641 = vmatprep.subr.bf16.mxu0 %v3091_v3 }
  0x20   : > { %s337_s19 = sadd.s32 %s2888_s9, %s2887_s14  ;;  %s2889_s14 = smul.u32 3, %s4327_s8 }
  0x21   : > { %s2382_s7 = sshll.u32 %s337_s19, 3  ;;  %2642 = vmatpush3.bf16.msra.mxu0 %v3091_v3  ;;  %s3321_s8 = smov 32  }
  0x22   : > { %s3463_s30 = scalar_lea.vmem %s4296_s0, %s2382_s7  ;;  %s3523_s19 = sadd.s32 %s2889_s14, %s2888_s9  ;;  %2643 = vmatprep.subr.bf16.mxu0 %v3092_v13 }
  0x23   : > { %v3469_v4 = vld [vmem:[%s3463_s30 + $0x18] sm:$0xff]  ;;  %v3472_v5 = vld [vmem:[%s3463_s30 + $0x20] sm:$0xff]  ;;  %v368_v6 = vld [vmem:[%s3463_s30 + $0x28] sm:$0x3]  ;;  %s2385_s29 = sshll.u32 %s3523_s19, 3 }
  0x24   : > { %v574_v7 = vrot.slane %v3469_v4, 2  ;;  %v575_v8 = vrot.slane %v3472_v5, 2  ;;  %v577_v9 = vrot.slane %v368_v6, 2  ;;  %v441_v10 = vrot.slane %v3469_v4, 1  ;;  %v3483_v11 = vld [vmem:[%s3463_s30 + $0x30] sm:$0xff]  ;;  %v3486_v12 = vld [vmem:[%s3463_s30 + $0x38] sm:$0xff]  ;;  %s3575_s27 = scalar_lea.vmem %s4297_s1, %s2385_s29 }
  0x25   : > { %v442_v14 = vrot.slane %v3472_v5, 1  ;;  %v444_v15 = vrot.slane %v368_v6, 1  ;;  %v371_v16 = vld [vmem:[%s3463_s30 + $0x40] sm:$0x3]  ;;  %v579_v17 = vrot.slane %v3483_v11, 2  ;;  %v580_v18 = vrot.slane %v3486_v12, 2  ;;  %2644 = vmatpush3.bf16.msra.mxu0 %v3092_v13 }
  0x26   : > { %v576_v19 = vsel %vm568_vm0, %v574_v7, %v575_v8  ;;  %v578_v20 = vsel %vm568_vm0, %v575_v8, %v577_v9  ;;  %v582_v21 = vrot.slane %v371_v16, 2  ;;  %v446_v22 = vrot.slane %v3483_v11, 1  ;;  %v3499_v23 = vld [vmem:[%s3463_s30 + $0x60] sm:$0xff]  ;;  %v3502_v24 = vld [vmem:[%s3463_s30 + $0x68] sm:$0xff]  ;;  %v377_v25 = vld [vmem:[%s3463_s30 + $0x70] sm:$0x3]  ;;  %2645 = vmatprep.subr.bf16.mxu0 %v3093_v45 }
  0x27   : > { %v2978_v26 = vpack.i.bf16 %v578_v20, %v576_v19  ;;  %v443_v27 = vsel %vm435_vm1, %v441_v10, %v442_v14  ;;  %v445_v28 = vsel %vm435_vm1, %v442_v14, %v444_v15  ;;  %v581_v29 = vsel %vm568_vm0, %v579_v17, %v580_v18  ;;  %v3509_v30 = vld [vmem:[%s3463_s30 + $0x48] sm:$0xff]  ;;  %v3512_v31 = vld [vmem:[%s3463_s30 + $0x50] sm:$0xff]  ;;  %v374_v36 = vld [vmem:[%s3463_s30 + $0x58] sm:$0x3] }
  0x28   : > { %v2968_v32 = vpack.i.bf16 %v445_v28, %v443_v27  ;;  %v583_v33 = vsel %vm568_vm0, %v580_v18, %v582_v21  ;;  %v447_v34 = vrot.slane %v3486_v12, 1  ;;  %v449_v35 = vrot.slane %v371_v16, 1  ;;  %v3547_v50 = vld [vmem:[%s3463_s30 + $0x90] sm:$0xff]  ;;  %v3557_v55 = vld [vmem:[%s3463_s30 + $0x98] sm:$0xff]  ;;  %v383_v56 = vld [vmem:[%s3463_s30 + $0xa0] sm:$0x3] }
  0x29   : > { %2979 = vrot.lane.b32.xlu1 %v2978_v26, %s3320_s17  ;;  %v2983_v37 = vpack.i.bf16 %v583_v33, %v581_v29  ;;  %v456_v38 = vrot.slane %v3499_v23, 1  ;;  %v457_v39 = vrot.slane %v3502_v24, 1  ;;  %v459_v40 = vrot.slane %v377_v25, 1  ;;  %v3567_v61 = vld [vmem:[%s3463_s30 + $0x78] sm:$0xff]  ;;  %v3570_v62 = vld [vmem:[%s3463_s30 + $0x80] sm:$0xff]  ;;  %2646 = vmatpush3.bf16.msra.mxu0 %v3093_v45 }
  0x2a   : > { %2969 = vrot.lane.b32.xlu0 %v2968_v32, %s3321_s8  ;;  %v3527_v41 = vsel %vm435_vm1, %v446_v22, %v447_v34  ;;  %v3530_v42 = vsel %vm435_vm1, %v447_v34, %v449_v35  ;;  %v451_v43 = vrot.slane %v3509_v30, 1  ;;  %v452_v44 = vrot.slane %v3512_v31, 1  ;;  %v380_v3 = vld [vmem:[%s3463_s30 + $0x88] sm:$0x3]  ;;  %v3590_v15 = vld [vmem:[%s3575_s27] sm:$0xff] }
  0x2b   : > { %v2973_v46 = vpack.i.bf16 %v3530_v42, %v3527_v41  ;;  %v3541_v47 = vsel %vm435_vm1, %v456_v38, %v457_v39  ;;  %v3544_v48 = vsel %vm435_vm1, %v457_v39, %v459_v40  ;;  %v454_v49 = vrot.slane %v374_v36, 1  ;;  %v389_v16 = vld [vmem:[%s3575_s27 + $0x10] sm:$0x3]  ;;  %v3596_v17 = vld [vmem:[%s4298_s2] sm:$0xff]   ;;  %v3606_v22 = vld [vmem:[%s3575_s27 + $0x8] sm:$0xff] }
  0x2c   : > { %v2993_v51 = vpack.i.bf16 %v3544_v48, %v3541_v47  ;;  %v3552_v52 = vsel %vm435_vm1, %v451_v43, %v452_v44  ;;  %v589_v53 = vrot.slane %v3499_v23, 2  ;;  %v590_v54 = vrot.slane %v3502_v24, 2  ;;  %v386_v32 = vld [vmem:[%s3463_s30 + $0xb8] sm:$0x3]  ;;  %2667 = vmatprep.subr.bf16.mxu0 %v3596_v17 }
  0x2d   : > { %2984 = vrot.lane.b32.xlu1 %v2983_v37, %s3320_s17  ;;  %v3562_v57 = vsel %vm435_vm1, %v452_v44, %v454_v49  ;;  %v592_v58 = vrot.slane %v377_v25, 2  ;;  %v584_v59 = vrot.slane %v3509_v30, 2  ;;  %v585_v60 = vrot.slane %v3512_v31, 2  ;;  %v3609_v25 = vld [vmem:[%s3463_s30 + $0xa8] sm:$0xff]  ;;  %v3625_v37 = vld [vmem:[%s3463_s30 + $0xb0] sm:$0xff] }
  0x2e   : > { %2974 = vrot.lane.b32.xlu0 %v2973_v46, %s3321_s8  ;;  %v2988_v63 = vpack.i.bf16 %v3562_v57, %v3552_v52  ;;  %v591_v0 = vsel %vm568_vm0, %v589_v53, %v590_v54  ;;  %v587_v1 = vrot.slane %v374_v36, 2  ;;  %v466_v2 = vrot.slane %v3547_v50, 1 }
  0x2f   : > { %v593_v6 = vsel %vm568_vm0, %v590_v54, %v592_v58  ;;  %v586_v7 = vsel %vm568_vm0, %v584_v59, %v585_v60  ;;  %v467_v8 = vrot.slane %v3557_v55, 1  ;;  %v469_v9 = vrot.slane %v383_v56, 1 }
  0x30   : > { %v588_v10 = vsel %vm568_vm0, %v585_v60, %v587_v1  ;;  %v461_v13 = vrot.slane %v3567_v61, 1  ;;  %v462_v14 = vrot.slane %v3570_v62, 1  ;;  %v3003_v18 = vpack.i.bf16 %v593_v6, %v591_v0  ;;  %v3651_v0 = vld [vmem:[%s3575_s27 + $0x38] sm:$0xff]  ;;  %v395_v1 = vld [vmem:[%s3575_s27 + $0x40] sm:$0x3] }
  0x31   : > { %2994 = vrot.lane.b32.xlu1 %v2993_v51, %s3321_s8  ;;  %v3600_v19 = vsel %vm435_vm1, %v466_v2, %v467_v8  ;;  %v3603_v20 = vsel %vm435_vm1, %v467_v8, %v469_v9  ;;  %v464_v21 = vrot.slane %v380_v3, 1  ;;  %v2998_v26 = vpack.i.bf16 %v588_v10, %v586_v7  ;;  %v392_v6 = vld [vmem:[%s3575_s27 + $0x28] sm:$0x3] }
  0x32   : > { %2989 = vrot.lane.b32.xlu0 %v2988_v63, %s3321_s8  ;;  %v3613_v27 = vsel %vm435_vm1, %v461_v13, %v462_v14  ;;  %v599_v28 = vrot.slane %v3547_v50, 2  ;;  %v600_v29 = vrot.slane %v3557_v55, 2  ;;  %v602_v34 = vrot.slane %v383_v56, 2  ;;  %v3641_v56 = vld [vmem:[%s3575_s27 + $0x30] sm:$0xff]  ;;  %v3661_v13 = vld [vmem:[%s3575_s27 + $0x18] sm:$0xff] }
  0x33   : > { %v3620_v33 = vsel %vm435_vm1, %v462_v14, %v464_v21  ;;  %v594_v35 = vrot.slane %v3567_v61, 2  ;;  %v595_v36 = vrot.slane %v3570_v62, 2  ;;  %v3013_v38 = vpack.i.bf16 %v3603_v20, %v3600_v19 }
  0x34   : > { %v597_v39 = vrot.slane %v380_v3, 2  ;;  %v476_v40 = vrot.slane %v3590_v15, 1  ;;  %v3008_v43 = vpack.i.bf16 %v3620_v33, %v3613_v27  ;;  %v601_v44 = vsel %vm568_vm0, %v599_v28, %v600_v29 }
  0x35   : > { %3004 = vrot.lane.b32.xlu1 %v3003_v18, %s3320_s17  ;;  %v477_v45 = vrot.slane %v3606_v22, 1  ;;  %v479_v46 = vrot.slane %v389_v16, 1  ;;  %v603_v49 = vsel %vm568_vm0, %v600_v29, %v602_v34  ;;  %v596_v51 = vsel %vm568_vm0, %v594_v35, %v595_v36 }
  0x36   : > { %2999 = vrot.lane.b32.xlu0 %v2998_v26, %s3320_s17  ;;  %v598_v53 = vsel %vm568_vm0, %v595_v36, %v597_v39  ;;  %v471_v54 = vrot.slane %v3609_v25, 1  ;;  %v472_v60 = vrot.slane %v3625_v37, 1  ;;  %v474_v63 = vrot.slane %v386_v32, 1  ;;  %v3667_v26 = vld [vmem:[%s3575_s27 + $0x20] sm:$0xff] }
  0x37   : > { %v3644_v58 = vsel %vm435_vm1, %v476_v40, %v477_v45  ;;  %v3647_v59 = vsel %vm435_vm1, %v477_v45, %v479_v46  ;;  %v609_v2 = vrot.slane %v3590_v15, 2  ;;  %v610_v3 = vrot.slane %v3606_v22, 2 }
  0x38   : > { %v3023_v7 = vpack.i.bf16 %v603_v49, %v601_v44  ;;  %v612_v8 = vrot.slane %v389_v16, 2  ;;  %v604_v9 = vrot.slane %v3609_v25, 2  ;;  %v605_v10 = vrot.slane %v3625_v37, 2 }
  0x39   : > { %3014 = vrot.lane.b32.xlu1 %v3013_v38, %s3321_s8  ;;  %v3018_v14 = vpack.i.bf16 %v598_v53, %v596_v51  ;;  %v3033_v18 = vpack.i.bf16 %v3647_v59, %v3644_v58  ;;  %v607_v21 = vrot.slane %v386_v32, 2  ;;  %v3670_v28 = vsel %vm435_vm1, %v471_v54, %v472_v60 }
  0x3a   : > { %3009 = vrot.lane.b32.xlu0 %v3008_v43, %s3321_s8  ;;  %v3673_v16 = vsel %vm435_vm1, %v472_v60, %v474_v63  ;;  %v611_v29 = vsel %vm568_vm0, %v609_v2, %v610_v3  ;;  %v486_v34 = vrot.slane %v3641_v56, 1  ;;  %v613_v35 = vsel %vm568_vm0, %v610_v3, %v612_v8 }
  0x3b   : > { %v606_v36 = vsel %vm568_vm0, %v604_v9, %v605_v10  ;;  %v487_v38 = vrot.slane %v3651_v0, 1  ;;  %v489_v39 = vrot.slane %v395_v1, 1  ;;  %v608_v32 = vsel %vm568_vm0, %v605_v10, %v607_v21  ;;  %v3702_v10 = vld [vmem:[%s3463_s30] sm:$0xff] }
  0x3c   : > { %v481_v40 = vrot.slane %v3661_v13, 1  ;;  %v482_v43 = vrot.slane %v3667_v26, 1  ;;  %v484_v44 = vrot.slane %v392_v6, 1  ;;  %v3028_v45 = vpack.i.bf16 %v3673_v16, %v3670_v28 }
  0x3d   : > { %3024 = vrot.lane.b32.xlu1 %v3023_v7, %s3320_s17  ;;  %v3043_v46 = vpack.i.bf16 %v613_v35, %v611_v29  ;;  %v3038_v49 = vpack.i.bf16 %v608_v32, %v606_v36  ;;  %v619_v51 = vrot.slane %v3641_v56, 2  ;;  %v620_v53 = vrot.slane %v3651_v0, 2 }
  0x3e   : > { %3019 = vrot.lane.b32.xlu0 %v3018_v14, %s3320_s17  ;;  %v488_v54 = vsel %vm435_vm1, %v486_v34, %v487_v38  ;;  %v490_v60 = vsel %vm435_vm1, %v487_v38, %v489_v39  ;;  %v3693_v63 = vsel %vm435_vm1, %v481_v40, %v482_v43  ;;  %v3696_v2 = vsel %vm435_vm1, %v482_v43, %v484_v44  ;;  %v3705_v14 = vld [vmem:[%s3463_s30 + $0x8] sm:$0xff] }
  0x3f   : > { %v622_v3 = vrot.slane %v395_v1, 2  ;;  %v614_v7 = vrot.slane %v3661_v13, 2  ;;  %v615_v8 = vrot.slane %v3667_v26, 2  ;;  %v617_v9 = vrot.slane %v392_v6, 2  ;;  %v3721_v44 = vld [vmem:[%s3575_s27 + $0x48] sm:$0xff] }
  0x40   : > { %v3053_v21 = vpack.i.bf16 %v490_v60, %v488_v54  ;;  %v3048_v29 = vpack.i.bf16 %v3696_v2, %v3693_v63  ;;  %v621_v34 = vsel %vm568_vm0, %v619_v51, %v620_v53  ;;  %v436_v1 = vrot.slane %v3702_v10, 1 }
  0x41   : > { %3034 = vrot.lane.b32.xlu1 %v3033_v18, %s3321_s8  ;;  %v365_v18 = vld [vmem:[%s3463_s30 + $0x10] sm:$0x3]  ;;  %v437_v6 = vrot.slane %v3705_v14, 1  ;;  %v569_v35 = vrot.slane %v3702_v10, 2  ;;  %v570_v36 = vrot.slane %v3705_v14, 2  ;;  %v623_v38 = vsel %vm568_vm0, %v620_v53, %v622_v3 }
  0x42   : > { %3029 = vrot.lane.b32.xlu0 %v3028_v45, %s3321_s8  ;;  %v616_v39 = vsel %vm568_vm0, %v614_v7, %v615_v8  ;;  %v618_v32 = vsel %vm568_vm0, %v615_v8, %v617_v9  ;;  %v572_v40 = vrot.slane %v365_v18, 2  ;;  %v439_v43 = vrot.slane %v365_v18, 1  ;;  %v3724_v45 = vld [vmem:[%s3575_s27 + $0x50] sm:$0xff] }
  0x43   : > { %v3063_v51 = vpack.i.bf16 %v623_v38, %v621_v34  ;;  %v3058_v54 = vpack.i.bf16 %v618_v32, %v616_v39  ;;  %v438_v60 = vsel %vm435_vm1, %v436_v1, %v437_v6  ;;  %v624_v3 = vrot.slane %v3721_v44, 2 }
  0x44   : > { %v573_v53 = vsel %vm568_vm0, %v570_v36, %v572_v40  ;;  %v625_v7 = vrot.slane %v3724_v45, 2  ;;  %v440_v9 = vsel %vm435_vm1, %v437_v6, %v439_v43  ;;  %v491_v18 = vrot.slane %v3721_v44, 1 }
  0x45   : > { %3044 = vrot.lane.b32.xlu1 %v3043_v46, %s3320_s17  ;;  %v398_v46 = vld [vmem:[%s3575_s27 + $0x58] sm:$0x3] }
  0x46   : > { %3039 = vrot.lane.b32.xlu0 %v3038_v49, %s3320_s17  ;;  %v571_v49 = vsel %vm568_vm0, %v569_v35, %v570_v36  ;;  %v627_v8 = vrot.slane %v398_v46, 2  ;;  %v494_v34 = vrot.slane %v398_v46, 1  ;;  %v626_v35 = vsel %vm568_vm0, %v624_v3, %v625_v7 }
  0x47   : > { %v3073_v1 = vpack.i.bf16 %v573_v53, %v571_v49 }
  0x48   : > { %v628_v36 = vsel %vm568_vm0, %v625_v7, %v627_v8 }
  0x49   : > { %3054 = vrot.lane.b32.xlu1 %v3053_v21, %s3321_s8  ;;  %v492_v21 = vrot.slane %v3724_v45, 1  ;;  %v3083_v6 = vpack.i.bf16 %v628_v36, %v626_v35 }
  0x4a   : > { %3049 = vrot.lane.b32.xlu0 %v3048_v29, %s3321_s8  ;;  %v3068_v29 = vpack.i.bf16 %v440_v9, %v438_v60 }
  0x4b   : > { %v493_v38 = vsel %vm435_vm1, %v491_v18, %v492_v21  ;;  %v495_v39 = vsel %vm435_vm1, %v492_v21, %v494_v34 }
  0x4c   : > { %v3078_v32 = vpack.i.bf16 %v495_v39, %v493_v38 }
  0x4d   : > { %3064 = vrot.lane.b32.xlu1 %v3063_v51, %s3320_s17 }
  0x4e   : > { %3059 = vrot.lane.b32.xlu0 %v3058_v54, %s3320_s17 }
  0x51   : > { %3074 = vrot.lane.b32.xlu1 %v3073_v1, %s3320_s17 }
  0x52   : > { %3069 = vrot.lane.b32.xlu0 %v3068_v29, %s3321_s8 }
  0x55   : > { %3084 = vrot.lane.b32.xlu1 %v3083_v6, %s3320_s17 }
  0x56   : > { %3079 = vrot.lane.b32.xlu0 %v3078_v32, %s3321_s8 }
  0x9b   : > { %v2980_v40 = vpop.permute.xlu1 %2979 }
  0x9c   : > { %v2982_v43 = vunpack.i.h.bf16 %v2980_v40  ;;  %v2981_v46 = vunpack.i.l.bf16 %v2980_v40  ;;  %v2970_v51 = vpop.permute.xlu0 %2969 }
  0x9d   : > { %v2972_v54 = vunpack.i.h.bf16 %v2970_v51  ;;  %v2971_v60 = vunpack.i.l.bf16 %v2970_v51 }
  0x9f   : > { %v2985_v49 = vpop.permute.xlu1 %2984  ;;  %v704_v53 = vsel %vm701_vm2, %v3469_v4, %v2971_v60  ;;  %v705_v3 = vsel %vm701_vm2, %v3472_v5, %v2972_v54 }
  0xa0   : > { %v2987_v7 = vunpack.i.h.bf16 %v2985_v49  ;;  %v2986_v8 = vunpack.i.l.bf16 %v2985_v49  ;;  %v2975_v9 = vpop.permute.xlu0 %2974  ;;  %v729_v18 = vsel %vm726_vm3, %v704_v53, %v2981_v46  ;;  %v730_v21 = vsel %vm726_vm3, %v705_v3, %v2982_v43 }
  0xa1   : > { %v2977_v34 = vunpack.i.h.bf16 %v2975_v9  ;;  %v2976_v1 = vunpack.i.l.bf16 %v2975_v9  ;;  %v3753_v29 = vpack.c.bf16 %v730_v21, %v729_v18 }
  0xa3   : > { %v707_v35 = vsel %vm701_vm2, %v3486_v12, %v2977_v34  ;;  %v706_v4 = vsel %vm701_vm2, %v3483_v11, %v2976_v1  ;;  %2647 = vmatprep.mubr.msk.bf16.mxu0 %vm824_vm4, %v3753_v29  ;;  %v2995_v5 = vpop.permute.xlu1 %2994  ;;  %v3095_v12 = vld [vmem:[%s4298_s2 + $0x8] sm:$0xff]  }
  0xa4   : > { %v2990_v36 = vpop.permute.xlu0 %2989  ;;  %v731_v38 = vsel %vm726_vm3, %v706_v4, %v2986_v8  ;;  %v732_v39 = vsel %vm726_vm3, %v707_v35, %v2987_v7  ;;  %v2997_v6 = vunpack.i.h.bf16 %v2995_v5  ;;  %v2996_v32 = vunpack.i.l.bf16 %v2995_v5  ;;  %v3096_v8 = vld [vmem:[%s4298_s2 + $0x10] sm:$0xff]  }
  0xa5   : > { %v3763_v40 = vpack.c.bf16 %v732_v39, %v731_v38  ;;  %v2992_v43 = vunpack.i.h.bf16 %v2990_v36  ;;  %v2991_v46 = vunpack.i.l.bf16 %v2990_v36 }
  0xa6   : > { %v711_v49 = vsel %vm701_vm2, %v3502_v24, %v2997_v6  ;;  %v710_v53 = vsel %vm701_vm2, %v3499_v23, %v2996_v32 }
  0xa7   : > { %2648 = vmatmul.mubr.msk.bf16.vlgmr.msra.gmra.mrb[0].mxu0 %vm824_vm4, %v3763_v40  ;;  %v3005_v11 = vpop.permute.xlu1 %3004  ;;  %v709_v9 = vsel %vm701_vm2, %v3512_v31, %v2992_v43 }
  0xa8   : > { %2668 = vmatpush3.bf16.msra.mxu0 %v3596_v17  ;;  %v3007_v51 = vunpack.i.h.bf16 %v3005_v11  ;;  %v3006_v54 = vunpack.i.l.bf16 %v3005_v11  ;;  %v3000_v60 = vpop.permute.xlu0 %2999  ;;  %v708_v17 = vsel %vm701_vm2, %v3509_v30, %v2991_v46  ;;  %v3097_v30 = vld [vmem:[%s4298_s2 + $0x18] sm:$0xff]  }
  0xa9   : > { %v3002_v3 = vunpack.i.h.bf16 %v3000_v60  ;;  %v3001_v7 = vunpack.i.l.bf16 %v3000_v60  ;;  %2669 = vmatprep.subr.bf16.mxu0 %v3095_v12 }
  0xaa   : > { %v735_v18 = vsel %vm726_vm3, %v710_v53, %v3006_v54  ;;  %v736_v24 = vsel %vm726_vm3, %v711_v49, %v3007_v51  ;;  %v3098_v54 = vld [vmem:[%s4298_s2 + $0x20] sm:$0xff]  }
  0xab   : > { %v3784_v21 = vpack.c.bf16 %v736_v24, %v735_v18  ;;  %v733_v23 = vsel %vm726_vm3, %v708_v17, %v3001_v7  ;;  %v734_v34 = vsel %vm726_vm3, %v709_v9, %v3002_v3  ;;  %v3015_v1 = vpop.permute.xlu1 %3014 }
  0xac   : > { %v3788_v35 = vpack.c.bf16 %v734_v34, %v733_v23  ;;  %v3010_v4 = vpop.permute.xlu0 %3009  ;;  %2670 = vmatpush3.bf16.msra.mxu0 %v3095_v12  ;;  %v3017_v5 = vunpack.i.h.bf16 %v3015_v1  ;;  %v3016_v31 = vunpack.i.l.bf16 %v3015_v1 }
  0xad   : > { %2671 = vmatprep.subr.bf16.mxu0 %v3096_v8  ;;  %v3012_v36 = vunpack.i.h.bf16 %v3010_v4  ;;  %v3011_v38 = vunpack.i.l.bf16 %v3010_v4 }
  0xae   : > { %2651 = vmatprep.mubr.msk.bf16.mxu0 %vm824_vm4, %v3788_v35  ;;  %v715_v12 = vsel %vm701_vm2, %v3557_v55, %v3017_v5  ;;  %v714_v46 = vsel %vm701_vm2, %v3547_v50, %v3016_v31 }
  0xaf   : > { %2652 = vmatmul.mubr.msk.bf16.gmra.mrb[4].mxu0 %vm824_vm4, %v3784_v21  ;;  %v3025_v39 = vpop.permute.xlu1 %3024  ;;  %v713_v60 = vsel %vm701_vm2, %v3570_v62, %v3012_v36  ;;  %v712_v49 = vsel %vm701_vm2, %v3567_v61, %v3011_v38  ;;  %v3099_v61 = vld [vmem:[%s4298_s2 + $0x28] sm:$0xff]  }
  0xb0   : > { %v3027_v6 = vunpack.i.h.bf16 %v3025_v39  ;;  %v3026_v32 = vunpack.i.l.bf16 %v3025_v39  ;;  %v3020_v43 = vpop.permute.xlu0 %3019  ;;  %2672 = vmatpush3.bf16.msra.mxu0 %v3096_v8  ;;  %v3100_v39 = vld [vmem:[%s4298_s2 + $0x60] sm:$0xff]  }
  0xb1   : > { %v3022_v11 = vunpack.i.h.bf16 %v3020_v43  ;;  %v3021_v51 = vunpack.i.l.bf16 %v3020_v43  ;;  %2673 = vmatprep.subr.bf16.mxu0 %v3097_v30 }
  0xb2   : > { %v739_v53 = vsel %vm726_vm3, %v714_v46, %v3026_v32  ;;  %v740_v55 = vsel %vm726_vm3, %v715_v12, %v3027_v6 }
  0xb3   : > { %v3810_v3 = vpack.c.bf16 %v740_v55, %v739_v53  ;;  %v737_v50 = vsel %vm726_vm3, %v712_v49, %v3021_v51  ;;  %v738_v7 = vsel %vm726_vm3, %v713_v60, %v3022_v11  ;;  %v3035_v8 = vpop.permute.xlu1 %3034 }
  0xb4   : > { %v3814_v9 = vpack.c.bf16 %v738_v7, %v737_v50  ;;  %v3030_v17 = vpop.permute.xlu0 %3029  ;;  %2674 = vmatpush3.bf16.msra.mxu0 %v3097_v30  ;;  %v3037_v18 = vunpack.i.h.bf16 %v3035_v8  ;;  %v3036_v62 = vunpack.i.l.bf16 %v3035_v8 }
  0xb5   : > { %2675 = vmatprep.subr.bf16.mxu0 %v3098_v54  ;;  %v3032_v24 = vunpack.i.h.bf16 %v3030_v17  ;;  %v3031_v23 = vunpack.i.l.bf16 %v3030_v17 }
  0xb6   : > { %2655 = vmatprep.mubr.msk.bf16.mxu0 %vm824_vm4, %v3814_v9  ;;  %v719_v31 = vsel %vm701_vm2, %v3606_v22, %v3037_v18  ;;  %v718_v30 = vsel %vm701_vm2, %v3590_v15, %v3036_v62 }
  0xb7   : > { %2656 = vmatmul.mubr.msk.bf16.gmra.mrb[8].mxu0 %vm824_vm4, %v3810_v3  ;;  %v3045_v34 = vpop.permute.xlu1 %3044  ;;  %v717_v6 = vsel %vm701_vm2, %v3625_v37, %v3032_v24  ;;  %v716_v32 = vsel %vm701_vm2, %v3609_v25, %v3031_v23 }
  0xb8   : > { %v3047_v1 = vunpack.i.h.bf16 %v3045_v34  ;;  %v3046_v4 = vunpack.i.l.bf16 %v3045_v34  ;;  %v3040_v5 = vpop.permute.xlu0 %3039  ;;  %2676 = vmatpush3.bf16.msra.mxu0 %v3098_v54 }
  0xb9   : > { %v3042_v36 = vunpack.i.h.bf16 %v3040_v5  ;;  %v3041_v38 = vunpack.i.l.bf16 %v3040_v5  ;;  %2677 = vmatprep.subr.bf16.mxu0 %v3099_v61 }
  0xba   : > { %v743_v43 = vsel %vm726_vm3, %v718_v30, %v3046_v4  ;;  %v744_v22 = vsel %vm726_vm3, %v719_v31, %v3047_v1 }
  0xbb   : > { %v3836_v12 = vpack.c.bf16 %v744_v22, %v743_v43  ;;  %v741_v15 = vsel %vm726_vm3, %v716_v32, %v3041_v38  ;;  %v742_v46 = vsel %vm726_vm3, %v717_v6, %v3042_v36  ;;  %v3055_v11 = vpop.permute.xlu1 %3054 }
  0xbc   : > { %v3840_v51 = vpack.c.bf16 %v742_v46, %v741_v15  ;;  %v3050_v54 = vpop.permute.xlu0 %3049  ;;  %2678 = vmatpush3.bf16.msra.mxu0 %v3099_v61  ;;  %v3057_v60 = vunpack.i.h.bf16 %v3055_v11  ;;  %v3056_v37 = vunpack.i.l.bf16 %v3055_v11  ;;  %v3101_v15 = vld [vmem:[%s4298_s2 + $0x68] sm:$0xff]  }
  0xbd   : > { %2699 = vmatprep.subr.bf16.mxu0 %v3100_v39  ;;  %v3052_v49 = vunpack.i.h.bf16 %v3050_v54  ;;  %v3051_v25 = vunpack.i.l.bf16 %v3050_v54 }
  0xbe   : > { %2659 = vmatprep.mubr.msk.bf16.mxu0 %vm824_vm4, %v3840_v51  ;;  %v723_v8 = vsel %vm701_vm2, %v3651_v0, %v3057_v60  ;;  %v722_v17 = vsel %vm701_vm2, %v3641_v56, %v3056_v37  ;;  %v3322_v37 = vmov 0.0  }
  0xbf   : > { %2660 = vmatmul.mubr.msk.bf16.gmra.mrb[12].mxu0 %vm824_vm4, %v3836_v12  ;;  %v3065_v53 = vpop.permute.xlu1 %3064  ;;  %v721_v61 = vsel %vm701_vm2, %v3667_v26, %v3052_v49  ;;  %v720_v24 = vsel %vm701_vm2, %v3661_v13, %v3051_v25  ;;  %1373 = vst.msk [vmem:[#allocation2] sm:$0x1] %vm1372_vm5, %v3322_v37  ;;  %1374 = vst.msk [vmem:[#allocation2 + $0x18] sm:$0x1] %vm1372_vm5, %v3322_v37 }
  0xc0   : > { %v3067_v55 = vunpack.i.h.bf16 %v3065_v53  ;;  %v3066_v50 = vunpack.i.l.bf16 %v3065_v53  ;;  %v3060_v7 = vpop.permute.xlu0 %3059  ;;  %1375 = vst.msk [vmem:[#allocation2 + $0x30] sm:$0x1] %vm1372_vm5, %v3322_v37  ;;  %1376 = vst.msk [vmem:[#allocation2 + $0x48] sm:$0x1] %vm1372_vm5, %v3322_v37 }
  0xc1   : > { %v3062_v18 = vunpack.i.h.bf16 %v3060_v7  ;;  %v3061_v62 = vunpack.i.l.bf16 %v3060_v7  ;;  %1377 = vst.msk [vmem:[#allocation2 + $0x60] sm:$0x1] %vm1372_vm5, %v3322_v37  ;;  %1378 = vst.msk [vmem:[#allocation2 + $0x78] sm:$0x1] %vm1372_vm5, %v3322_v37 }
  0xc2   : > { %v747_v23 = vsel %vm726_vm3, %v722_v17, %v3066_v50  ;;  %v748_v34 = vsel %vm726_vm3, %v723_v8, %v3067_v55  ;;  %1379 = vst.msk [vmem:[#allocation2 + $0x90] sm:$0x1] %vm1372_vm5, %v3322_v37  ;;  %1380 = vst.msk [vmem:[#allocation2 + $0xa8] sm:$0x1] %vm1372_vm5, %v3322_v37 }
  0xc3   : > { %v761_v1 = vpack.c.bf16 %v748_v34, %v747_v23  ;;  %v745_v4 = vsel %vm726_vm3, %v720_v24, %v3061_v62  ;;  %v746_v0 = vsel %vm726_vm3, %v721_v61, %v3062_v18  ;;  %v3075_v5 = vpop.permute.xlu1 %3074  ;;  %1381 = vst.msk [vmem:[#allocation2 + $0xc0] sm:$0x1] %vm1372_vm5, %v3322_v37  ;;  %1382 = vst.msk [vmem:[#allocation2 + $0xd8] sm:$0x1] %vm1372_vm5, %v3322_v37 }
  0xc4   : > { %v760_v31 = vpack.c.bf16 %v746_v0, %v745_v4  ;;  %v3070_v56 = vpop.permute.xlu0 %3069  ;;  %v3077_v30 = vunpack.i.h.bf16 %v3075_v5  ;;  %v3076_v36 = vunpack.i.l.bf16 %v3075_v5  ;;  %1383 = vst.msk [vmem:[#allocation2 + $0x11] sm:$0x1] %vm1372_vm5, %v3322_v37  ;;  %1384 = vst.msk [vmem:[#allocation2 + $0x29] sm:$0x1] %vm1372_vm5, %v3322_v37 }
  0xc5   : > { %v3072_v38 = vunpack.i.h.bf16 %v3070_v56  ;;  %v3071_v6 = vunpack.i.l.bf16 %v3070_v56  ;;  %1385 = vst.msk [vmem:[#allocation2 + $0x41] sm:$0x1] %vm1372_vm5, %v3322_v37  ;;  %1386 = vst.msk [vmem:[#allocation2 + $0x59] sm:$0x1] %vm1372_vm5, %v3322_v37 }
  0xc6   : > { %2663 = vmatprep.mubr.msk.bf16.mxu0 %vm824_vm4, %v760_v31  ;;  %1387 = vst.msk [vmem:[#allocation2 + $0x71] sm:$0x1] %vm1372_vm5, %v3322_v37  ;;  %1388 = vst.msk [vmem:[#allocation2 + $0x89] sm:$0x1] %vm1372_vm5, %v3322_v37 }
  0xc7   : > { %2664 = vmatmul.mubr.msk.bf16.gmra.mrb[16].mxu0 %vm824_vm4, %v761_v1  ;;  %v703_v13 = vsel %vm701_vm2, %v3705_v14, %v3072_v38  ;;  %v702_v26 = vsel %vm701_vm2, %v3702_v10, %v3071_v6  ;;  %v3102_v10 = vld [vmem:[%s4298_s2 + $0x70] sm:$0xff]   ;;  %v3103_v14 = vld [vmem:[%s4298_s2 + $0x78] sm:$0xff]   ;;  %v3085_v54 = vpop.permute.xlu1 %3084  ;;  %1389 = vst.msk [vmem:[#allocation2 + $0xa1] sm:$0x1] %vm1372_vm5, %v3322_v37  ;;  %1390 = vst.msk [vmem:[#allocation2 + $0xb9] sm:$0x1] %vm1372_vm5, %v3322_v37 }
  0xc8   : > { %v727_v32 = vsel %vm726_vm3, %v702_v26, %v3076_v36  ;;  %v728_v43 = vsel %vm726_vm3, %v703_v13, %v3077_v30  ;;  %v3080_v46 = vpop.permute.xlu0 %3079  ;;  %v3086_v60 = vunpack.i.l.bf16 %v3085_v54  ;;  %1391 = vst.msk [vmem:[#allocation2 + $0xd1] sm:$0x1] %vm1372_vm5, %v3322_v37  ;;  %1392 = vst.msk [vmem:[#allocation2 + $0xe9] sm:$0x1] %vm1372_vm5, %v3322_v37 }
  0xc9   : > { %v751_v22 = vpack.c.bf16 %v728_v43, %v727_v32  ;;  %v3081_v11 = vunpack.i.l.bf16 %v3080_v46 }
  0xcb   : > { %2679 = vmatprep.mubr.msk.bf16.mxu0 %vm824_vm4, %v751_v22 }
  0xcf   : > { %2680 = vmatmul.mubr.msk.bf16.vlgmr.msra.gmra.mrb[0].mxu0 %vm824_vm4, %v3753_v29  ;;  %v3104_v29 = vld [vmem:[%s4298_s2 + $0x80] sm:$0xff]  }
  0xd0   : > { %2700 = vmatpush3.bf16.msra.mxu0 %v3100_v39  ;;  %2683 = vmatprep.mubr.msk.bf16.mxu0 %vm824_vm4, %v3763_v40  ;;  %v3105_v39 = vld [vmem:[%s4298_s2 + $0x88] sm:$0xff]  }
  0xd1   : > { %2701 = vmatprep.subr.bf16.mxu0 %v3101_v15 }
  0xd4   : > { %2702 = vmatpush3.bf16.msra.mxu0 %v3101_v15 }
  0xd5   : > { %2703 = vmatprep.subr.bf16.mxu0 %v3102_v10 }
  0xd7   : > { %2684 = vmatmul.mubr.msk.bf16.gmra.mrb[4].mxu0 %vm824_vm4, %v3788_v35 }
  0xd8   : > { %2687 = vmatprep.mubr.msk.bf16.mxu0 %vm824_vm4, %v3784_v21  ;;  %2704 = vmatpush3.bf16.msra.mxu0 %v3102_v10 }
  0xd9   : > { %2705 = vmatprep.subr.bf16.mxu0 %v3103_v14 }
  0xdc   : > { %2706 = vmatpush3.bf16.msra.mxu0 %v3103_v14 }
  0xdd   : > { %2707 = vmatprep.subr.bf16.mxu0 %v3104_v29 }
  0xdf   : > { %2688 = vmatmul.mubr.msk.bf16.gmra.mrb[8].mxu0 %vm824_vm4, %v3814_v9 }
  0xe0   : > { %2691 = vmatprep.mubr.msk.bf16.mxu0 %vm824_vm4, %v3810_v3  ;;  %2708 = vmatpush3.bf16.msra.mxu0 %v3104_v29 }
  0xe1   : > { %2709 = vmatprep.subr.bf16.mxu0 %v3105_v39 }
  0xe4   : > { %2710 = vmatpush3.bf16.msra.mxu0 %v3105_v39 }
  0xe7   : > { %2692 = vmatmul.mubr.msk.bf16.gmra.mrb[12].mxu0 %vm824_vm4, %v3840_v51 }
  0xe8   : > { %2695 = vmatprep.mubr.msk.bf16.mxu0 %vm824_vm4, %v3836_v12 }
  0xef   : > { %2696 = vmatmul.mubr.msk.bf16.gmra.mrb[16].mxu0 %vm824_vm4, %v760_v31 }
  0xf0   : > { %2711 = vmatprep.mubr.msk.bf16.mxu0 %vm824_vm4, %v3763_v40  ;;  %v3082_v40 = vunpack.i.h.bf16 %v3080_v46 }
  0xf7   : > { %2712 = vmatmul.mubr.msk.bf16.vlgmr.msra.gmra.mrb[0].mxu0 %vm824_vm4, %v3788_v35  ;;  %v3087_v35 = vunpack.i.h.bf16 %v3085_v54 }
  0xf8   : > { %2715 = vmatprep.mubr.msk.bf16.mxu0 %vm824_vm4, %v3784_v21  ;;  %v725_v21 = vsel %vm701_vm2, %v3724_v45, %v3082_v40 }
  0xff   : > { %2716 = vmatmul.mubr.msk.bf16.gmra.mrb[4].mxu0 %vm824_vm4, %v3814_v9  ;;  %v724_v9 = vsel %vm701_vm2, %v3721_v44, %v3081_v11  ;;  %v3945_v44 = vld [vmem:[%s4299_s3] ss:$0 sm:$0xff] }
 0x100   : > { %2719 = vmatprep.mubr.msk.bf16.mxu0 %vm824_vm4, %v3810_v3  ;;  %v749_v3 = vsel %vm726_vm3, %v724_v9, %v3086_v60 }
 0x107   : > { %2720 = vmatmul.mubr.msk.bf16.gmra.mrb[8].mxu0 %vm824_vm4, %v3840_v51  ;;  %v750_v51 = vsel %vm726_vm3, %v725_v21, %v3087_v35 }
 0x108   : > { %2723 = vmatprep.mubr.msk.bf16.mxu0 %vm824_vm4, %v3836_v12  ;;  %v762_v12 = vpack.c.bf16 %v750_v51, %v749_v3 }
 0x10f   : > { %2724 = vmatmul.mubr.msk.bf16.gmra.mrb[12].mxu0 %vm824_vm4, %v760_v31 }
 0x110   : > { %2727 = vmatprep.mubr.msk.bf16.mxu0 %vm824_vm4, %v761_v1 }
 0x117   : > { %2728 = vmatmul.mubr.msk.bf16.gmra.mrb[16].mxu0 %vm824_vm4, %v762_v12 }
 0x1ca   : > { %v2713_v45 = vpop.f32.mrb[0].mxu0 }
 0x1cb   : > { %v1314_v49 = vadd.f32 %v2713_v45, %v3945_v44  ;;  %v1206_v25 = vpop.f32.mrb[1].mxu0 }
 0x1cc   : > { %v1312_v53 = vadd.f32 %v3945_v44, %v1206_v25  ;;  %v2714_v55 = vpop.f32.mrb[2].mxu0 }
 0x1cd   : > { %v1334_v50 = vmax.f32 %v1314_v49, 0.0  ;;  %v1315_v7 = vadd.f32 %v2714_v55, %v3945_v44  ;;  %v1209_v8 = vpop.f32.mrb[3].mxu0 }
 0x1ce   : > { %v1332_v17 = vmax.f32 %v1312_v53, 0.0  ;;  %v1313_v18 = vadd.f32 %v3945_v44, %v1209_v8 }
 0x1cf   : > { %1354 = vst.msk [vmem:[#allocation2 + $0x19] sm:$0xff] %vm701_vm2, %v1334_v50  ;;  %v1335_v62 = vmax.f32 %v1315_v7, 0.0 }
 0x1d0   : > { %1352 = vst.msk [vmem:[#allocation2 + $0x1] sm:$0xff] %vm701_vm2, %v1332_v17  ;;  %v1333_v61 = vmax.f32 %v1313_v18, 0.0 }
 0x1d1   : > { %1355 = vst.msk [vmem:[#allocation2 + $0x21] sm:$0xff] %vm701_vm2, %v1335_v62 }
 0x1d2   : > { %1353 = vst.msk [vmem:[#allocation2 + $0x9] sm:$0xff] %vm701_vm2, %v1333_v61  ;;  %v2717_v24 = vpop.f32.mrb[4].mxu0 }
 0x1d3   : > { %v1318_v23 = vadd.f32 %v2717_v24, %v3945_v44  ;;  %v1222_v34 = vpop.f32.mrb[5].mxu0 }
 0x1d4   : > { %v1316_v1 = vadd.f32 %v3945_v44, %v1222_v34  ;;  %v2718_v4 = vpop.f32.mrb[6].mxu0 }
 0x1d5   : > { %v1338_v0 = vmax.f32 %v1318_v23, 0.0  ;;  %v1319_v5 = vadd.f32 %v2718_v4, %v3945_v44  ;;  %v1225_v31 = vpop.f32.mrb[7].mxu0  ;;  %v3323_v23 = vmov (!%p2459_p1), 0.0  }
 0x1d6   : > { %v1336_v56 = vmax.f32 %v1316_v1, 0.0  ;;  %v1317_v30 = vadd.f32 %v3945_v44, %v1225_v31  ;;  %1397 = vst.msk [vmem:[#allocation2] sm:$0xff] (!%p2459_p1), %vm701_vm2, %v3323_v23  ;;  %1398 = vst.msk [vmem:[#allocation2 + $0x8] sm:$0xff] (!%p2459_p1), %vm701_vm2, %v3323_v23 }
 0x1d7   : > { %1358 = vst.msk [vmem:[#allocation2 + $0x49] sm:$0xff] %vm701_vm2, %v1338_v0  ;;  %v1339_v36 = vmax.f32 %v1319_v5, 0.0 }
 0x1d8   : > { %1356 = vst.msk [vmem:[#allocation2 + $0x31] sm:$0xff] %vm701_vm2, %v1336_v56  ;;  %v1337_v38 = vmax.f32 %v1317_v30, 0.0 }
 0x1d9   : > { %1359 = vst.msk [vmem:[#allocation2 + $0x51] sm:$0xff] %vm701_vm2, %v1339_v36 }
 0x1da   : > { %1357 = vst.msk [vmem:[#allocation2 + $0x39] sm:$0xff] %vm701_vm2, %v1337_v38  ;;  %v2721_v6 = vpop.f32.mrb[8].mxu0 }
 0x1db   : > { %v1322_v13 = vadd.f32 %v2721_v6, %v3945_v44  ;;  %v1238_v26 = vpop.f32.mrb[9].mxu0  ;;  %1400 = vst.msk [vmem:[#allocation2 + $0x10] sm:$0x3] (!%p2459_p1), %vm1399_vm6, %v3323_v23 }
 0x1dc   : > { %v1320_v32 = vadd.f32 %v3945_v44, %v1238_v26  ;;  %v2722_v43 = vpop.f32.mrb[10].mxu0 }
 0x1dd   : > { %v1342_v22 = vmax.f32 %v1322_v13, 0.0  ;;  %v1323_v15 = vadd.f32 %v2722_v43, %v3945_v44  ;;  %v1241_v10 = vpop.f32.mrb[11].mxu0 }
 0x1de   : > { %v1340_v14 = vmax.f32 %v1320_v32, 0.0  ;;  %v1321_v29 = vadd.f32 %v3945_v44, %v1241_v10 }
 0x1df   : > { %1362 = vst.msk [vmem:[#allocation2 + $0x79] sm:$0xff] %vm701_vm2, %v1342_v22  ;;  %v1343_v39 = vmax.f32 %v1323_v15, 0.0 }
 0x1e0   : > { %1360 = vst.msk [vmem:[#allocation2 + $0x61] sm:$0xff] %vm701_vm2, %v1340_v14  ;;  %v1341_v46 = vmax.f32 %v1321_v29, 0.0 }
 0x1e1   : > { %1363 = vst.msk [vmem:[#allocation2 + $0x81] sm:$0xff] %vm701_vm2, %v1343_v39 }
 0x1e2   : > { %1361 = vst.msk [vmem:[#allocation2 + $0x69] sm:$0xff] %vm701_vm2, %v1341_v46  ;;  %v2725_v40 = vpop.f32.mrb[12].mxu0 }
 0x1e3   : > { %v1326_v11 = vadd.f32 %v2725_v40, %v3945_v44  ;;  %v1254_v54 = vpop.f32.mrb[13].mxu0 }
 0x1e4   : > { %v1324_v35 = vadd.f32 %v3945_v44, %v1254_v54  ;;  %v2726_v60 = vpop.f32.mrb[14].mxu0 }
 0x1e5   : > { %v1346_v21 = vmax.f32 %v1326_v11, 0.0  ;;  %v1327_v9 = vadd.f32 %v2726_v60, %v3945_v44  ;;  %v1257_v3 = vpop.f32.mrb[15].mxu0 }
 0x1e6   : > { %v1344_v51 = vmax.f32 %v1324_v35, 0.0  ;;  %v1325_v12 = vadd.f32 %v3945_v44, %v1257_v3 }
 0x1e7   : > { %1366 = vst.msk [vmem:[#allocation2 + $0xa9] sm:$0xff] %vm701_vm2, %v1346_v21  ;;  %v1347_v37 = vmax.f32 %v1327_v9, 0.0 }
 0x1e8   : > { %1364 = vst.msk [vmem:[#allocation2 + $0x91] sm:$0xff] %vm701_vm2, %v1344_v51  ;;  %v1345_v45 = vmax.f32 %v1325_v12, 0.0 }
 0x1e9   : > { %1367 = vst.msk [vmem:[#allocation2 + $0xb1] sm:$0xff] %vm701_vm2, %v1347_v37 }
 0x1ea   : > { %1365 = vst.msk [vmem:[#allocation2 + $0x99] sm:$0xff] %vm701_vm2, %v1345_v45  ;;  %v2729_v49 = vpop.f32.mrb[16].mxu0 }
 0x1eb   : > { %v1330_v25 = vadd.f32 %v2729_v49, %v3945_v44  ;;  %v1270_v53 = vpop.f32.mrb[17].mxu0 }
 0x1ec   : > { %v1328_v55 = vadd.f32 %v3945_v44, %v1270_v53  ;;  %v2730_v50 = vpop.f32.mrb[18].mxu0  ;;  %1396 = sbr.rel (%p2459_p1) target bundleno = 499 (0x1f3), region = 48 }
 0x1ed   : > { %v1350_v7 = vmax.f32 %v1330_v25, 0.0  ;;  %v1331_v8 = vadd.f32 %v2730_v50, %v3945_v44  ;;  %v1273_v17 = vpop.f32.mrb[19].mxu0 }
 0x1ee   : > { %v1348_v18 = vmax.f32 %v1328_v55, 0.0  ;;  %v1329_v62 = vadd.f32 %v3945_v44, %v1273_v17 }
 0x1ef   : > { %1370 = vst.msk [vmem:[#allocation2 + $0xd9] sm:$0xff] %vm701_vm2, %v1350_v7  ;;  %v1351_v61 = vmax.f32 %v1331_v8, 0.0 }
 0x1f0   : > { %1368 = vst.msk [vmem:[#allocation2 + $0xc1] sm:$0xff] %vm701_vm2, %v1348_v18  ;;  %v1349_v24 = vmax.f32 %v1329_v62, 0.0 }
 0x1f1   : > { %1371 = vst.msk [vmem:[#allocation2 + $0xe1] sm:$0xff] %vm701_vm2, %v1351_v61 }
 0x1f2   : > { %1369 = vst.msk [vmem:[#allocation2 + $0xc9] sm:$0xff] %vm701_vm2, %v1349_v24 }
 0x1f3 PF: > { %p2460_p2 = scmp.ne.s32.totalorder %s3302_s24, 1 }
 0x1f4   : > { %vm1408_vm7 = vcmask (!%p2460_p2), 254976   ;;  %v3324_v44 = vmov (!%p2460_p2), 0.0  }
 0x1f5   : > { %1404 = sbr.rel (%p2460_p2) target bundleno = 508 (0x1fc), region = 52  ;;  %1406 = vst.msk [vmem:[#allocation2 + $0xd8] sm:$0xff] (!%p2460_p2), %vm701_vm2, %v3324_v44  ;;  %1407 = vst.msk [vmem:[#allocation2 + $0xe0] sm:$0xff] (!%p2460_p2), %vm701_vm2, %v3324_v44 }
 0x1f6   : > { %1409 = vst.msk [vmem:[#allocation2 + $0xe8] sm:$0x3] (!%p2460_p2), %vm1408_vm7, %v3324_v44 }
 0x1fc PF: > { %v1452_v34 = vld [vmem:[#allocation2 + $0x1a] sm:$0xff]  ;;  %v1453_v1 = vld [vmem:[#allocation2 + $0x22] sm:$0xff]  ;;  %v1454_v31 = vld [vmem:[#allocation2 + $0x32] sm:$0xff]  ;;  %s4244_s29 = scalar_lea.sflag [#allocation4], %s322_s18  ;;  %s3325_s20 = smov [#allocation3]  }
 0x1fd   : > { %v1432_v4 = vld [vmem:[#allocation2 + $0x19] sm:$0xff]  ;;  %v3116_v0 = vpack.i.bf16 %v1453_v1, %v1452_v34  ;;  %v1433_v5 = vld [vmem:[#allocation2 + $0x21] sm:$0xff]  ;;  %v1434_v36 = vld [vmem:[#allocation2 + $0x31] sm:$0xff]  ;;  %s3228_s16 = sshll.u32 %s3325_s20, 4  ;;  %s3229_s16 = int_to_ptr.vmem [resolvable:$false] %s3228_s16 }
 0x1fe   : > { %v1455_v56 = vld [vmem:[#allocation2 + $0x3a] sm:$0xff]  ;;  %v3106_v30 = vpack.i.bf16 %v1433_v5, %v1432_v4  ;;  %v1439_v32 = vld [vmem:[#allocation2 + $0x69] sm:$0xff]  ;;  %v1437_v22 = vld [vmem:[#allocation2 + $0x51] sm:$0xff]  ;;  %s3230_s13 = scalar_lea.vmem %s3229_s16, 4096 }
 0x1ff   : > { %v1435_v38 = vld [vmem:[#allocation2 + $0x39] sm:$0xff]  ;;  %3117 = vrot.lane.b32.xlu1 %v3116_v0, %s3320_s17  ;;  %v3121_v6 = vpack.i.bf16 %v1455_v56, %v1454_v31  ;;  %v1438_v26 = vld [vmem:[#allocation2 + $0x61] sm:$0xff]  ;;  %v1436_v43 = vld [vmem:[#allocation2 + $0x49] sm:$0xff] }
 0x200   : > { %3107 = vrot.lane.b32.xlu0 %v3106_v30, %s3321_s8  ;;  %v3111_v13 = vpack.i.bf16 %v1435_v38, %v1434_v36  ;;  %v3131_v15 = vpack.i.bf16 %v1439_v32, %v1438_v26  ;;  %v3126_v10 = vpack.i.bf16 %v1437_v22, %v1436_v43  ;;  %v1458_v14 = vld [vmem:[#allocation2 + $0x62] sm:$0xff]  ;;  %v1459_v29 = vld [vmem:[#allocation2 + $0x6a] sm:$0xff]  ;;  %v1457_v46 = vld [vmem:[#allocation2 + $0x52] sm:$0xff] }
 0x201   : > { %v1456_v39 = vld [vmem:[#allocation2 + $0x4a] sm:$0xff]  ;;  %v3141_v40 = vpack.i.bf16 %v1459_v29, %v1458_v14  ;;  %v1443_v35 = vld [vmem:[#allocation2 + $0x99] sm:$0xff]  ;;  %v1441_v21 = vld [vmem:[#allocation2 + $0x81] sm:$0xff] }
 0x202   : > { %v3136_v11 = vpack.i.bf16 %v1457_v46, %v1456_v39  ;;  %v1442_v54 = vld [vmem:[#allocation2 + $0x91] sm:$0xff]  ;;  %v1440_v60 = vld [vmem:[#allocation2 + $0x79] sm:$0xff]  ;;  %v1461_v25 = vld [vmem:[#allocation2 + $0x82] sm:$0xff] }
 0x203   : > { %3122 = vrot.lane.b32.xlu1 %v3121_v6, %s3320_s17  ;;  %v1462_v9 = vld [vmem:[#allocation2 + $0x92] sm:$0xff]  ;;  %v1463_v3 = vld [vmem:[#allocation2 + $0x9a] sm:$0xff]  ;;  %v3151_v12 = vpack.i.bf16 %v1443_v35, %v1442_v54  ;;  %v3146_v45 = vpack.i.bf16 %v1441_v21, %v1440_v60  ;;  %v1447_v8 = vld [vmem:[#allocation2 + $0xc9] sm:$0xff] }
 0x204   : > { %3112 = vrot.lane.b32.xlu0 %v3111_v13, %s3321_s8  ;;  %v3206_v51 = vld [vmem:[%s4300_s4 + $0x30] sm:$0xff]   ;;  %v3207_v37 = vld [vmem:[%s4300_s4 + $0x38] sm:$0xff]   ;;  %v3208_v53 = vld [vmem:[%s4300_s4 + $0x40] sm:$0xff]   ;;  %v3161_v55 = vpack.i.bf16 %v1463_v3, %v1462_v9 }
 0x205   : > { %v1460_v49 = vld [vmem:[#allocation2 + $0x7a] sm:$0xff]  ;;  %2731 = vmatprep.subr.bf16.mxu1 %v3206_v51  ;;  %v1444_v17 = vld [vmem:[#allocation2 + $0xa9] sm:$0xff]  ;;  %v1445_v18 = vld [vmem:[#allocation2 + $0xb1] sm:$0xff] }
 0x206   : > { %2732 = vmatpush3.bf16.msra.mxu1 %v3206_v51  ;;  %v3156_v50 = vpack.i.bf16 %v1461_v25, %v1460_v49  ;;  %v1446_v7 = vld [vmem:[#allocation2 + $0xc1] sm:$0xff]  ;;  %v1467_v23 = vld [vmem:[#allocation2 + $0xca] sm:$0xff]  ;;  %v3166_v44 = vpack.i.bf16 %v1445_v18, %v1444_v17  ;;  %v1465_v1 = vld [vmem:[#allocation2 + $0xb2] sm:$0xff] }
 0x207   : > { %3132 = vrot.lane.b32.xlu1 %v3131_v15, %s3321_s8  ;;  %2733 = vmatprep.subr.bf16.mxu1 %v3207_v37  ;;  %v3209_v62 = vld [vmem:[%s4300_s4 + $0x48] sm:$0xff]   ;;  %v3171_v61 = vpack.i.bf16 %v1447_v8, %v1446_v7  ;;  %v3210_v4 = vld [vmem:[%s4300_s4 + $0x50] sm:$0xff]   ;;  %v3211_v38 = vld [vmem:[%s4300_s4 + $0x58] sm:$0xff]  }
 0x208   : > { %3127 = vrot.lane.b32.xlu0 %v3126_v10, %s3321_s8  ;;  %v1466_v24 = vld [vmem:[#allocation2 + $0xc2] sm:$0xff]  ;;  %v1464_v34 = vld [vmem:[#allocation2 + $0xaa] sm:$0xff]  ;;  %v1448_v13 = vld [vmem:[#allocation2 + $0xd9] sm:$0xff] }
 0x209   : > { %v3181_v0 = vpack.i.bf16 %v1467_v23, %v1466_v24  ;;  %v1450_v5 = vld [vmem:[#allocation2 + $0x2] sm:$0xff]  ;;  %v3176_v31 = vpack.i.bf16 %v1465_v1, %v1464_v34  ;;  %v1451_v56 = vld [vmem:[#allocation2 + $0xa] sm:$0xff]  ;;  %v1468_v32 = vld [vmem:[#allocation2 + $0xda] sm:$0xff] }
 0x20a   : > { %2734 = vmatpush3.bf16.msra.mxu1 %v3207_v37  ;;  %v1430_v30 = vld [vmem:[#allocation2 + $0x1] sm:$0xff]  ;;  %v1431_v36 = vld [vmem:[#allocation2 + $0x9] sm:$0xff]  ;;  %v3191_v6 = vpack.i.bf16 %v1451_v56, %v1450_v5  ;;  %v1415_v49 = vld [vmem:[#allocation2 + $0x38] sm:$0xff] }
 0x20b   : > { %3142 = vrot.lane.b32.xlu1 %v3141_v40, %s3320_s17  ;;  %2735 = vmatprep.subr.bf16.mxu1 %v3208_v53  ;;  %v1449_v26 = vld [vmem:[#allocation2 + $0xe1] sm:$0xff]  ;;  %v3186_v43 = vpack.i.bf16 %v1431_v36, %v1430_v30  ;;  %v1417_v30 = vld [vmem:[#allocation2 + $0x50] sm:$0xff] }
 0x20c   : > { %3137 = vrot.lane.b32.xlu0 %v3136_v11, %s3320_s17  ;;  %v1469_v22 = vld [vmem:[#allocation2 + $0xe2] sm:$0xff]  ;;  %v3196_v14 = vpack.i.bf16 %v1449_v26, %v1448_v13  ;;  %v1412_v11 = vld [vmem:[#allocation2 + $0x18] sm:$0xff] }
 0x20d   : > { %v3212_v15 = vld [vmem:[%s4300_s4] sm:$0xff]   ;;  %v3201_v10 = vpack.i.bf16 %v1469_v22, %v1468_v32  ;;  %v3213_v1 = vld [vmem:[%s4300_s4 + $0x8] sm:$0xff]  }
 0x20e   : > { %2736 = vmatpush3.bf16.msra.mxu1 %v3208_v53  ;;  %v1413_v54 = vld [vmem:[#allocation2 + $0x20] sm:$0xff]  ;;  %v1416_v56 = vld [vmem:[#allocation2 + $0x48] sm:$0xff] }
 0x20f   : > { %3152 = vrot.lane.b32.xlu1 %v3151_v12, %s3321_s8  ;;  %2737 = vmatprep.subr.bf16.mxu1 %v3209_v62 }
 0x210   : > { %3147 = vrot.lane.b32.xlu0 %v3146_v45, %s3321_s8  ;;  %v1414_v45 = vld [vmem:[#allocation2 + $0x30] sm:$0xff] }
 0x212   : > { %2738 = vmatpush3.bf16.msra.mxu1 %v3209_v62 }
 0x213   : > { %3162 = vrot.lane.b32.xlu1 %v3161_v55, %s3320_s17  ;;  %2739 = vmatprep.subr.bf16.mxu1 %v3210_v4 }
 0x214   : > { %3157 = vrot.lane.b32.xlu0 %v3156_v50, %s3320_s17 }
 0x216   : > { %2740 = vmatpush3.bf16.msra.mxu1 %v3210_v4  ;;  %v1418_v4 = vld [vmem:[#allocation2 + $0x60] sm:$0xff] }
 0x217   : > { %3172 = vrot.lane.b32.xlu1 %v3171_v61, %s3321_s8  ;;  %2741 = vmatprep.subr.bf16.mxu1 %v3211_v38 }
 0x218   : > { %3167 = vrot.lane.b32.xlu0 %v3166_v44, %s3321_s8 }
 0x21a   : > { %2742 = vmatpush3.bf16.msra.mxu1 %v3211_v38 }
 0x21b   : > { %3182 = vrot.lane.b32.xlu1 %v3181_v0, %s3320_s17  ;;  %2759 = vmatprep.subr.bf16.mxu1 %v3212_v15  ;;  %v1419_v0 = vld [vmem:[#allocation2 + $0x68] sm:$0xff] }
 0x21c   : > { %3177 = vrot.lane.b32.xlu0 %v3176_v31, %s3320_s17 }
 0x21f   : > { %3192 = vrot.lane.b32.xlu1 %v3191_v6, %s3320_s17 }
 0x220   : > { %3187 = vrot.lane.b32.xlu0 %v3186_v43, %s3321_s8 }
 0x223   : > { %3202 = vrot.lane.b32.xlu1 %v3201_v10, %s3320_s17  ;;  %v3214_v10 = vld [vmem:[%s4300_s4 + $0x10] sm:$0xff]   ;;  %s2542_s17 = sshll.u32 %s3302_s24, 4 }
 0x224   : > { %3197 = vrot.lane.b32.xlu0 %v3196_v14, %s3321_s8  ;;  %s2531_s8 = sshll.u32 %s3306_s25, 5  ;;  %s2267_s25 = sshll.u32 %s3988_s12, 4  ;;  %s4234_s25 = int_to_ptr.vmem [resolvable:$true] %s2267_s25 }
 0x225   : > { %s2264_s7 = sadd.s32 %s2542_s17, %s2531_s8  ;;  %s3224_s9 = scalar_lea.vmem %s4234_s25, 2048 }
 0x226   : > { %s2532_s24 = sshll.u32 %s2264_s7, 7  ;;  %p3225_p4 = scmp.ne.s32.totalorder %s4234_s25, %s3224_s9 }
 0x227   : > { %s4232_s19 = scalar_lea.hbm %s4302_s6, %s2532_s24  ;;  %p3231_p7 = scmp.lt.s32.totalorder %s4234_s25, %s3229_s16 }
 0x228   : > { %p3226_p5 = pnand %p3225_p4, %p3414_p3  ;;  %p3232_p9 = scmp.lt.s32.totalorder %s3230_s13, %s3224_s9 }
 0x22a   : > { %p3227_p6 = pneg %p3226_p5  ;;  %p3233_p10 = por %p3232_p9, %p3231_p7 }
 0x22c   : > { %p3234_p11 = pnand %p3233_p10, %p3227_p6 }
 0x271   : > { %v3118_v29 = vpop.permute.xlu1 %3117 }
 0x272   : > { %v3120_v39 = vunpack.i.h.bf16 %v3118_v29  ;;  %v3119_v46 = vunpack.i.l.bf16 %v3118_v29  ;;  %v3108_v40 = vpop.permute.xlu0 %3107 }
 0x273   : > { %v3110_v35 = vunpack.i.h.bf16 %v3108_v40  ;;  %v3109_v60 = vunpack.i.l.bf16 %v3108_v40 }
 0x275   : > { %v3123_v21 = vpop.permute.xlu1 %3122  ;;  %v1632_v9 = vsel %vm701_vm2, %v1412_v11, %v3109_v60  ;;  %v1633_v3 = vsel %vm701_vm2, %v1413_v54, %v3110_v35 }
 0x276   : > { %v3125_v51 = vunpack.i.h.bf16 %v3123_v21  ;;  %v3124_v12 = vunpack.i.l.bf16 %v3123_v21  ;;  %v3113_v37 = vpop.permute.xlu0 %3112  ;;  %v1652_v25 = vsel %vm726_vm3, %v1632_v9, %v3119_v46  ;;  %v1653_v53 = vsel %vm726_vm3, %v1633_v3, %v3120_v39  ;;  %v3215_v3 = vld [vmem:[%s4300_s4 + $0x18] sm:$0xff]  }
 0x277   : > { %v3115_v55 = vunpack.i.h.bf16 %v3113_v37  ;;  %v3114_v50 = vunpack.i.l.bf16 %v3113_v37  ;;  %v4041_v7 = vpack.c.bf16 %v1653_v53, %v1652_v25  ;;  %v1421_v25 = vld [vmem:[#allocation2 + $0x80] sm:$0xff] }
 0x279   : > { %v1634_v8 = vsel %vm701_vm2, %v1414_v45, %v3114_v50  ;;  %v1635_v17 = vsel %vm701_vm2, %v1415_v49, %v3115_v55  ;;  %2743 = vmatprep.mubr.msk.bf16.mxu1 %vm824_vm4, %v4041_v7  ;;  %v3133_v18 = vpop.permute.xlu1 %3132  ;;  %v1420_v49 = vld [vmem:[#allocation2 + $0x78] sm:$0xff] }
 0x27a   : > { %v1654_v62 = vsel %vm726_vm3, %v1634_v8, %v3124_v12  ;;  %v1655_v61 = vsel %vm726_vm3, %v1635_v17, %v3125_v51  ;;  %v3128_v24 = vpop.permute.xlu0 %3127  ;;  %v3135_v23 = vunpack.i.h.bf16 %v3133_v18  ;;  %v3134_v44 = vunpack.i.l.bf16 %v3133_v18  ;;  %v1422_v51 = vld [vmem:[#allocation2 + $0x90] sm:$0xff]  ;;  %v1423_v12 = vld [vmem:[#allocation2 + $0x98] sm:$0xff] }
 0x27b   : > { %v4049_v34 = vpack.c.bf16 %v1655_v61, %v1654_v62  ;;  %v3130_v5 = vunpack.i.h.bf16 %v3128_v24  ;;  %v3129_v31 = vunpack.i.l.bf16 %v3128_v24  ;;  %v3216_v24 = vld [vmem:[%s4300_s4 + $0x20] sm:$0xff]  }
 0x27c   : > { %v1638_v26 = vsel %vm701_vm2, %v1418_v4, %v3134_v44  ;;  %v1639_v32 = vsel %vm701_vm2, %v1419_v0, %v3135_v23 }
 0x27d   : > { %2744 = vmatmul.mubr.msk.bf16.vlgmr.msra.gmra.mrb[0].mxu1 %vm824_vm4, %v4049_v34  ;;  %v3143_v36 = vpop.permute.xlu1 %3142  ;;  %v1636_v14 = vsel %vm701_vm2, %v1416_v56, %v3129_v31  ;;  %v1637_v29 = vsel %vm701_vm2, %v1417_v30, %v3130_v5 }
 0x27e   : > { %2760 = vmatpush3.bf16.msra.mxu1 %v3212_v15  ;;  %v3145_v38 = vunpack.i.h.bf16 %v3143_v36  ;;  %v3144_v6 = vunpack.i.l.bf16 %v3143_v36  ;;  %v3138_v13 = vpop.permute.xlu0 %3137 }
 0x27f   : > { %v3140_v43 = vunpack.i.h.bf16 %v3138_v13  ;;  %v3139_v22 = vunpack.i.l.bf16 %v3138_v13  ;;  %2761 = vmatprep.subr.bf16.mxu1 %v3213_v1  ;;  %v3217_v13 = vld [vmem:[%s4300_s4 + $0x28] sm:$0xff]  }
 0x280   : > { %v1658_v15 = vsel %vm726_vm3, %v1638_v26, %v3144_v6  ;;  %v1659_v39 = vsel %vm726_vm3, %v1639_v32, %v3145_v38  ;;  %v1426_v26 = vld [vmem:[#allocation2 + $0xc0] sm:$0xff]  ;;  %v1427_v32 = vld [vmem:[#allocation2 + $0xc8] sm:$0xff] }
 0x281   : > { %v1656_v46 = vsel %vm726_vm3, %v1636_v14, %v3139_v22  ;;  %v1657_v40 = vsel %vm726_vm3, %v1637_v29, %v3140_v43  ;;  %v3153_v11 = vpop.permute.xlu1 %3152  ;;  %v4067_v54 = vpack.c.bf16 %v1659_v39, %v1658_v15  ;;  %v1425_v14 = vld [vmem:[#allocation2 + $0xb0] sm:$0xff] }
 0x282   : > { %v3148_v35 = vpop.permute.xlu0 %3147  ;;  %2762 = vmatpush3.bf16.msra.mxu1 %v3213_v1  ;;  %v4069_v60 = vpack.c.bf16 %v1657_v40, %v1656_v46  ;;  %v3155_v21 = vunpack.i.h.bf16 %v3153_v11  ;;  %v3154_v9 = vunpack.i.l.bf16 %v3153_v11 }
 0x283   : > { %2763 = vmatprep.subr.bf16.mxu1 %v3214_v10  ;;  %v3150_v37 = vunpack.i.h.bf16 %v3148_v35  ;;  %v3149_v45 = vunpack.i.l.bf16 %v3148_v35 }
 0x284   : > { %2747 = vmatprep.mubr.msk.bf16.mxu1 %vm824_vm4, %v4069_v60  ;;  %v1642_v17 = vsel %vm701_vm2, %v1422_v51, %v3154_v9  ;;  %v1643_v18 = vsel %vm701_vm2, %v1423_v12, %v3155_v21  ;;  %v3218_v9 = vld [vmem:[%s4300_s4 + $0x60] sm:$0xff]  }
 0x285   : > { %2748 = vmatmul.mubr.msk.bf16.gmra.mrb[4].mxu1 %vm824_vm4, %v4067_v54  ;;  %v3163_v53 = vpop.permute.xlu1 %3162  ;;  %v1640_v23 = vsel %vm701_vm2, %v1420_v49, %v3149_v45  ;;  %v1641_v44 = vsel %vm701_vm2, %v1421_v25, %v3150_v37 }
 0x286   : > { %v3165_v55 = vunpack.i.h.bf16 %v3163_v53  ;;  %v3164_v50 = vunpack.i.l.bf16 %v3163_v53  ;;  %v3158_v8 = vpop.permute.xlu0 %3157  ;;  %2764 = vmatpush3.bf16.msra.mxu1 %v3214_v10  ;;  %v1424_v10 = vld [vmem:[#allocation2 + $0xa8] sm:$0xff] }
 0x287   : > { %v3160_v62 = vunpack.i.h.bf16 %v3158_v8  ;;  %v3159_v61 = vunpack.i.l.bf16 %v3158_v8  ;;  %2765 = vmatprep.subr.bf16.mxu1 %v3215_v3  ;;  %v1410_v8 = vld [vmem:[#allocation2] sm:$0xff] }
 0x288   : > { %v1662_v1 = vsel %vm726_vm3, %v1642_v17, %v3164_v50  ;;  %v1663_v4 = vsel %vm726_vm3, %v1643_v18, %v3165_v55  ;;  %v1411_v17 = vld [vmem:[#allocation2 + $0x8] sm:$0xff] }
 0x289   : > { %v1660_v0 = vsel %vm726_vm3, %v1640_v23, %v3159_v61  ;;  %v1661_v5 = vsel %vm726_vm3, %v1641_v44, %v3160_v62  ;;  %v3173_v31 = vpop.permute.xlu1 %3172  ;;  %v4089_v56 = vpack.c.bf16 %v1663_v4, %v1662_v1 }
 0x28a   : > { %v3168_v30 = vpop.permute.xlu0 %3167  ;;  %v4091_v36 = vpack.c.bf16 %v1661_v5, %v1660_v0  ;;  %2766 = vmatpush3.bf16.msra.mxu1 %v3215_v3  ;;  %v3175_v38 = vunpack.i.h.bf16 %v3173_v31  ;;  %v3174_v6 = vunpack.i.l.bf16 %v3173_v31  ;;  %v3219_v5 = vld [vmem:[%s4300_s4 + $0x68] sm:$0xff]   ;;  %v3220_v31 = vld [vmem:[%s4300_s4 + $0x70] sm:$0xff]  }
 0x28b   : > { %2767 = vmatprep.subr.bf16.mxu1 %v3216_v24  ;;  %v3170_v43 = vunpack.i.h.bf16 %v3168_v30  ;;  %v3169_v22 = vunpack.i.l.bf16 %v3168_v30  ;;  %v3221_v30 = vld [vmem:[%s4300_s4 + $0x78] sm:$0xff]  }
 0x28c   : > { %2751 = vmatprep.mubr.msk.bf16.mxu1 %vm824_vm4, %v4091_v36  ;;  %v1646_v40 = vsel %vm701_vm2, %v1426_v26, %v3174_v6  ;;  %v1647_v11 = vsel %vm701_vm2, %v1427_v32, %v3175_v38  ;;  %v3223_v38 = vld [vmem:[%s4300_s4 + $0x88] sm:$0xff]  }
 0x28d   : > { %2752 = vmatmul.mubr.msk.bf16.gmra.mrb[8].mxu1 %vm824_vm4, %v4089_v56  ;;  %v3183_v29 = vpop.permute.xlu1 %3182  ;;  %v1644_v3 = vsel %vm701_vm2, %v1424_v10, %v3169_v22  ;;  %v1645_v51 = vsel %vm701_vm2, %v1425_v14, %v3170_v43  ;;  %v1428_v43 = vld [vmem:[#allocation2 + $0xd8] sm:$0xff]  ;;  %v1429_v22 = vld [vmem:[#allocation2 + $0xe0] sm:$0xff] }
 0x28e   : > { %v3185_v15 = vunpack.i.h.bf16 %v3183_v29  ;;  %v3184_v39 = vunpack.i.l.bf16 %v3183_v29  ;;  %v3178_v46 = vpop.permute.xlu0 %3177  ;;  %2768 = vmatpush3.bf16.msra.mxu1 %v3216_v24  ;;  %v4166_v29 = vld [vmem:[%s4301_s5] ss:$0 sm:$0xff] }
 0x28f   : > { %v3180_v35 = vunpack.i.h.bf16 %v3178_v46  ;;  %v3179_v21 = vunpack.i.l.bf16 %v3178_v46  ;;  %2769 = vmatprep.subr.bf16.mxu1 %v3217_v13 }
 0x290   : > { %v1666_v12 = vsel %vm726_vm3, %v1646_v40, %v3184_v39  ;;  %v1667_v37 = vsel %vm726_vm3, %v1647_v11, %v3185_v15 }
 0x291   : > { %v1664_v45 = vsel %vm726_vm3, %v1644_v3, %v3179_v21  ;;  %v1665_v49 = vsel %vm726_vm3, %v1645_v51, %v3180_v35  ;;  %v1678_v25 = vpack.c.bf16 %v1667_v37, %v1666_v12  ;;  %v3193_v53 = vpop.permute.xlu1 %3192 }
 0x292   : > { %v1677_v55 = vpack.c.bf16 %v1665_v49, %v1664_v45  ;;  %v3188_v50 = vpop.permute.xlu0 %3187  ;;  %v3195_v18 = vunpack.i.h.bf16 %v3193_v53  ;;  %v3194_v62 = vunpack.i.l.bf16 %v3193_v53  ;;  %2770 = vmatpush3.bf16.msra.mxu1 %v3217_v13 }
 0x293   : > { %v3190_v61 = vunpack.i.h.bf16 %v3188_v50  ;;  %v3189_v24 = vunpack.i.l.bf16 %v3188_v50  ;;  %2787 = vmatprep.subr.bf16.mxu1 %v3218_v9 }
 0x294   : > { %2755 = vmatprep.mubr.msk.bf16.mxu1 %vm824_vm4, %v1677_v55 }
 0x295   : > { %v1630_v23 = vsel %vm701_vm2, %v1410_v8, %v3189_v24  ;;  %v1631_v44 = vsel %vm701_vm2, %v1411_v17, %v3190_v61  ;;  %2756 = vmatmul.mubr.msk.bf16.gmra.mrb[12].mxu1 %vm824_vm4, %v1678_v25  ;;  %v3203_v32 = vpop.permute.xlu1 %3202 }
 0x296   : > { %v1650_v1 = vsel %vm726_vm3, %v1630_v23, %v3194_v62  ;;  %v1651_v4 = vsel %vm726_vm3, %v1631_v44, %v3195_v18  ;;  %v3198_v6 = vpop.permute.xlu0 %3197  ;;  %v3205_v10 = vunpack.i.h.bf16 %v3203_v32 }
 0x297   : > { %v1670_v0 = vpack.c.bf16 %v1651_v4, %v1650_v1  ;;  %v3200_v13 = vunpack.i.h.bf16 %v3198_v6  ;;  %v3199_v26 = vunpack.i.l.bf16 %v3198_v6 }
 0x299   : > { %2771 = vmatprep.mubr.msk.bf16.mxu1 %vm824_vm4, %v1670_v0  ;;  %v1648_v14 = vsel %vm701_vm2, %v1428_v43, %v3199_v26 }
 0x29d   : > { %2772 = vmatmul.mubr.msk.bf16.vlgmr.msra.gmra.mrb[0].mxu1 %vm824_vm4, %v4041_v7  ;;  %v3222_v7 = vld [vmem:[%s4300_s4 + $0x80] sm:$0xff]  }
 0x29e   : > { %2788 = vmatpush3.bf16.msra.mxu1 %v3218_v9  ;;  %2775 = vmatprep.mubr.msk.bf16.mxu1 %vm824_vm4, %v4049_v34 }
 0x29f   : > { %2789 = vmatprep.subr.bf16.mxu1 %v3219_v5 }
 0x2a2   : > { %2790 = vmatpush3.bf16.msra.mxu1 %v3219_v5 }
 0x2a3   : > { %2791 = vmatprep.subr.bf16.mxu1 %v3220_v31 }
 0x2a5   : > { %2776 = vmatmul.mubr.msk.bf16.gmra.mrb[4].mxu1 %vm824_vm4, %v4069_v60 }
 0x2a6   : > { %2779 = vmatprep.mubr.msk.bf16.mxu1 %vm824_vm4, %v4067_v54  ;;  %2792 = vmatpush3.bf16.msra.mxu1 %v3220_v31 }
 0x2a7   : > { %2793 = vmatprep.subr.bf16.mxu1 %v3221_v30 }
 0x2aa   : > { %2794 = vmatpush3.bf16.msra.mxu1 %v3221_v30 }
 0x2ab   : > { %2795 = vmatprep.subr.bf16.mxu1 %v3222_v7 }
 0x2ad   : > { %2780 = vmatmul.mubr.msk.bf16.gmra.mrb[8].mxu1 %vm824_vm4, %v4091_v36 }
 0x2ae   : > { %2783 = vmatprep.mubr.msk.bf16.mxu1 %vm824_vm4, %v4089_v56  ;;  %2796 = vmatpush3.bf16.msra.mxu1 %v3222_v7 }
 0x2af   : > { %2797 = vmatprep.subr.bf16.mxu1 %v3223_v38 }
 0x2b2   : > { %2798 = vmatpush3.bf16.msra.mxu1 %v3223_v38 }
 0x2b5   : > { %2784 = vmatmul.mubr.msk.bf16.gmra.mrb[12].mxu1 %vm824_vm4, %v1677_v55 }
 0x2b6   : > { %2799 = vmatprep.mubr.msk.bf16.mxu1 %vm824_vm4, %v4049_v34  ;;  %v3204_v34 = vunpack.i.l.bf16 %v3203_v32 }
 0x2bd   : > { %2800 = vmatmul.mubr.msk.bf16.vlgmr.msra.gmra.mrb[0].mxu1 %vm824_vm4, %v4069_v60  ;;  %v1649_v60 = vsel %vm701_vm2, %v1429_v22, %v3200_v13 }
 0x2be   : > { %2803 = vmatprep.mubr.msk.bf16.mxu1 %vm824_vm4, %v4067_v54  ;;  %v1668_v54 = vsel %vm726_vm3, %v1648_v14, %v3204_v34 }
 0x2c5   : > { %2804 = vmatmul.mubr.msk.bf16.gmra.mrb[4].mxu1 %vm824_vm4, %v4091_v36  ;;  %v1669_v36 = vsel %vm726_vm3, %v1649_v60, %v3205_v10 }
 0x2c6   : > { %2807 = vmatprep.mubr.msk.bf16.mxu1 %vm824_vm4, %v4089_v56  ;;  %v1679_v56 = vpack.c.bf16 %v1669_v36, %v1668_v54 }
 0x2cd   : > { %2808 = vmatmul.mubr.msk.bf16.gmra.mrb[8].mxu1 %vm824_vm4, %v1677_v55 }
 0x2ce   : > { %2811 = vmatprep.mubr.msk.bf16.mxu1 %vm824_vm4, %v1678_v25 }
 0x2d5   : > { %2812 = vmatmul.mubr.msk.bf16.gmra.mrb[12].mxu1 %vm824_vm4, %v1679_v56 }
 0x390   : > { %v2801_v15 = vpop.f32.mrb[0].mxu1 }
 0x391   : > { %v2188_v39 = vadd.f32 %v2801_v15, %v4166_v29  ;;  %v2084_v46 = vpop.f32.mrb[1].mxu1 }
 0x392   : > { %v2186_v40 = vadd.f32 %v4166_v29, %v2084_v46  ;;  %v2802_v11 = vpop.f32.mrb[2].mxu1 }
 0x393   : > { %v2204_v35 = vadd.f32 %v2188_v39, %v3552_v52  ;;  %v2189_v21 = vadd.f32 %v2802_v11, %v4166_v29  ;;  %v2087_v9 = vpop.f32.mrb[3].mxu1 }
 0x394   : > { %v2202_v3 = vadd.f32 %v2186_v40, %v3527_v41  ;;  %v2187_v51 = vadd.f32 %v4166_v29, %v2087_v9 }
 0x395   : > { %v2220_v12 = vmax.f32 %v2204_v35, 0.0  ;;  %v2205_v37 = vadd.f32 %v2189_v21, %v3562_v57 }
 0x396   : > { %v2218_v45 = vmax.f32 %v2202_v3, 0.0  ;;  %v2203_v49 = vadd.f32 %v2187_v51, %v3530_v42 }
 0x397   : > { %2236 = vst.msk [vmem:[%s3988_s12 + $0x10] sm:$0xff] %vm701_vm2, %v2220_v12  ;;  %v2221_v25 = vmax.f32 %v2205_v37, 0.0 }
 0x398   : > { %2234 = vst.msk [vmem:[%s3988_s12] sm:$0xff] %vm701_vm2, %v2218_v45  ;;  %v2219_v52 = vmax.f32 %v2203_v49, 0.0  ;;  %v2805_v53 = vpop.f32.mrb[4].mxu1 }
 0x399   : > { %2237 = vst.msk [vmem:[%s3988_s12 + $0x18] sm:$0xff] %vm701_vm2, %v2221_v25  ;;  %v2192_v41 = vadd.f32 %v2805_v53, %v4166_v29  ;;  %v2100_v55 = vpop.f32.mrb[5].mxu1 }
 0x39a   : > { %2235 = vst.msk [vmem:[%s3988_s12 + $0x8] sm:$0xff] %vm701_vm2, %v2219_v52  ;;  %v2190_v57 = vadd.f32 %v4166_v29, %v2100_v55  ;;  %v2806_v42 = vpop.f32.mrb[6].mxu1 }
 0x39b   : > { %v2208_v50 = vadd.f32 %v2192_v41, %v3613_v27  ;;  %v2193_v8 = vadd.f32 %v2806_v42, %v4166_v29  ;;  %v2103_v17 = vpop.f32.mrb[7].mxu1 }
 0x39c   : > { %v2206_v18 = vadd.f32 %v2190_v57, %v3541_v47  ;;  %v2191_v62 = vadd.f32 %v4166_v29, %v2103_v17 }
 0x39d   : > { %v2224_v61 = vmax.f32 %v2208_v50, 0.0  ;;  %v2209_v24 = vadd.f32 %v2193_v8, %v3620_v33 }
 0x39e   : > { %v2222_v23 = vmax.f32 %v2206_v18, 0.0  ;;  %v2207_v44 = vadd.f32 %v2191_v62, %v3544_v48 }
 0x39f   : > { %2240 = vst.msk [vmem:[%s3988_s12 + $0x30] sm:$0xff] %vm701_vm2, %v2224_v61  ;;  %v2225_v1 = vmax.f32 %v2209_v24, 0.0 }
 0x3a0   : > { %2238 = vst.msk [vmem:[%s3988_s12 + $0x20] sm:$0xff] %vm701_vm2, %v2222_v23  ;;  %v2223_v27 = vmax.f32 %v2207_v44, 0.0  ;;  %v2809_v4 = vpop.f32.mrb[8].mxu1 }
 0x3a1   : > { %2241 = vst.msk [vmem:[%s3988_s12 + $0x38] sm:$0xff] %vm701_vm2, %v2225_v1  ;;  %v2196_v47 = vadd.f32 %v2809_v4, %v4166_v29  ;;  %v2116_v0 = vpop.f32.mrb[9].mxu1 }
 0x3a2   : > { %2239 = vst.msk [vmem:[%s3988_s12 + $0x28] sm:$0xff] %vm701_vm2, %v2223_v27  ;;  %v2194_v48 = vadd.f32 %v4166_v29, %v2116_v0  ;;  %v2810_v33 = vpop.f32.mrb[10].mxu1 }
 0x3a3   : > { %v2212_v5 = vadd.f32 %v2196_v47, %v3670_v28  ;;  %v2197_v31 = vadd.f32 %v2810_v33, %v4166_v29  ;;  %v2119_v30 = vpop.f32.mrb[11].mxu1 }
 0x3a4   : > { %v2210_v7 = vadd.f32 %v2194_v48, %v3600_v19  ;;  %v2195_v38 = vadd.f32 %v4166_v29, %v2119_v30 }
 0x3a5   : > { %v2228_v6 = vmax.f32 %v2212_v5, 0.0  ;;  %v2213_v13 = vadd.f32 %v2197_v31, %v3673_v16 }
 0x3a6   : > { %v2226_v26 = vmax.f32 %v2210_v7, 0.0  ;;  %v2211_v32 = vadd.f32 %v2195_v38, %v3603_v20 }
 0x3a7   : > { %2244 = vst.msk [vmem:[%s3988_s12 + $0x50] sm:$0xff] %vm701_vm2, %v2228_v6  ;;  %v2229_v28 = vmax.f32 %v2213_v13, 0.0 }
 0x3a8   : > { %2242 = vst.msk [vmem:[%s3988_s12 + $0x40] sm:$0xff] %vm701_vm2, %v2226_v26  ;;  %v2227_v43 = vmax.f32 %v2211_v32, 0.0  ;;  %v2813_v22 = vpop.f32.mrb[12].mxu1 }
 0x3a9   : > { %2245 = vst.msk [vmem:[%s3988_s12 + $0x58] sm:$0xff] %vm701_vm2, %v2229_v28  ;;  %v2200_v19 = vadd.f32 %v2813_v22, %v4166_v29  ;;  %v2132_v10 = vpop.f32.mrb[13].mxu1 }
 0x3aa   : > { %2243 = vst.msk [vmem:[%s3988_s12 + $0x48] sm:$0xff] %vm701_vm2, %v2227_v43  ;;  %v2198_v20 = vadd.f32 %v4166_v29, %v2132_v10  ;;  %v2814_v16 = vpop.f32.mrb[14].mxu1 }
 0x3ab   : > { %v2216_v34 = vadd.f32 %v2200_v19, %v3693_v63  ;;  %v2201_v14 = vadd.f32 %v2814_v16, %v4166_v29  ;;  %v2135_v60 = vpop.f32.mrb[15].mxu1 }
 0x3ac   : > { %v2214_v54 = vadd.f32 %v2198_v20, %v3644_v58  ;;  %v2199_v36 = vadd.f32 %v4166_v29, %v2135_v60 }
 0x3ad   : > { %v2232_v56 = vmax.f32 %v2216_v34, 0.0  ;;  %v2217_v15 = vadd.f32 %v2201_v14, %v3696_v2 }
 0x3ae   : > { %v2230_v39 = vmax.f32 %v2214_v54, 0.0  ;;  %v2215_v46 = vadd.f32 %v2199_v36, %v3647_v59 }
 0x3af   : > { %2248 = vst.msk [vmem:[%s3988_s12 + $0x70] sm:$0xff] %vm701_vm2, %v2232_v56  ;;  %v2233_v63 = vmax.f32 %v2217_v15, 0.0 }
 0x3b0   : > { %2246 = vst.msk [vmem:[%s3988_s12 + $0x60] sm:$0xff] %vm701_vm2, %v2230_v39  ;;  %v2231_v58 = vmax.f32 %v2215_v46, 0.0 }
 0x3b1   : > { %2249 = vst.msk [vmem:[%s3988_s12 + $0x78] sm:$0xff] %vm701_vm2, %v2233_v63 }
 0x3b2   : > { %2247 = vst.msk [vmem:[%s3988_s12 + $0x68] sm:$0xff] %vm701_vm2, %v2231_v58 }
 0x3b3   : > { %3237 = shalt.err (!%p3234_p11)
}
 0x3b4   : > { %s3238_s18 = scalar_lea.hbm %s4232_s19, 2048  ;;  %s3242_s17 = scalar_lea.hbm %s4302_s6, 8192 }
 0x3b5   : > { %p3239_p12 = scmp.ne.s32.totalorder %s4232_s19, %s3238_s18  ;;  %p3243_p1 = scmp.lt.u32.totalorder %s4232_s19, %s4302_s6 }
 0x3b6   : > { %p3244_p2 = scmp.lt.u32.totalorder %s3242_s17, %s3238_s18  ;;  %p3246_p5 = scmp.lt.u32.totalorder %s3238_s18, %s4232_s19 }
 0x3b7   : > { %p3240_p13 = pnand %p3239_p12, %p3414_p3 }
 0x3b8   : > { %p3245_p4 = por %p3244_p2, %p3243_p1 }
 0x3b9   : > { %p3241_p0 = pneg %p3240_p13 }
 0x3ba   : > { %p3247_p6 = por %p3246_p5, %p3245_p4 }
 0x3bc   : > { %p3248_p7 = pnand %p3247_p6, %p3241_p0 }
 0x3be   : > { %3251 = shalt.err (!%p3248_p7)
}
 0x3bf   : > { %s3326_s24 = smov 128   ;;  %s3327_s14 = smov 8  }
 0x3c0   : > { %2890 = dma.vmem_to_hbm [thread:$0]  (%p3414_p3), %s4234_s25, 2048, %s4232_s19, %s4244_s29, %s3326_s24, %s3326_s24, %s3327_s14  }
 0x3c1 PF: > { %p2896_p9 = scmp.ge.s32.totalorder %s3318_s28, 2  ;;  %s2282_s30 = sand.u32 1, %s3290_s21  }
 0x3c2   : > { %s2283_s9 = scalar_lea.sflag [#allocation4], %s2282_s30 }
 0x3c3   : > { %p2893_p10 = pnand %p2896_p9, %p3423_p8 }
 0x3c5   : > { %3285 = dma.done.wait (!%p2893_p10), %s2283_s9, 2048  }
 0x3c6   : > { %3287 = vsyncadd (!%p2893_p10), %s2283_s9, 4294965248  ;;  %s19_s28 = sadd.s32 1, %s3318_s28   ;;  %s4312_s25 = sld [smem:[#allocation6_spill]] }
 0x3c7   : > { %p16_p11 = scmp.ge.s32.totalorder %s19_s28, 6   ;;  %s4313_s10 = sld [smem:[#allocation7_spill]] }
 0x3c8   : > { %s4314_s27 = sld [smem:[#allocation8_spill]]  ;;  %s4315_s21 = smov %s3294_s22 }
 0x3c9   : > { %s4316_s22 = smov %s3298_s23  ;;  %s4317_s23 = smov %s3432_s15 }
 0x3ca   : > { %s4318_s24 = smov %s3310_s26  ;;  %18 = sbr.rel (!%p16_p11) target bundleno = 5 (0x5), region = 95 }
 0x3cd   : > { %s4319_s26 = smov %s4313_s10 }
 0x3d1   :  { %2288 = vsyncpa [#allocation4], 1 }
 0x3d2   :  { %2290 = vsyncpa [#allocation4 + $0x1], 1 }

</bundles_post_ra>
